<compile_context>
chip_gen: v5e
topology: v5e:2x2
jax: 0.10.0
libtpu: 0.0.40
codegen_flags: <defaults>
</compile_context>

<pallas_src>
import functools

import jax
import jax.numpy as jnp
from jax import lax
from jax.experimental import pallas as pl
from jax.experimental.pallas import tpu as pltpu

# ---- model hyper-parameters (n == d is required by the original forward,
#      because concat([M (B,n,d), A (B,d,d)], dim=-1) forces n == d) ----------
NUM_Q = 10
N = 32           # sequence length
D = 32           # hidden dim  (== N)
NUM_HEADS = 4
BERT_LEN = 512   # forced by at2_emb_layer = Linear(512, d)
BERT_HID = 768   # forced by at_emb_layer  = Linear(768, d)
BERT_VOCAB = 64
B = 2
LN_EPS = 1e-5


def _layer_norm(x, gamma, beta):
    mu = jnp.mean(x, axis=-1, keepdims=True)
    var = jnp.mean((x - mu) * (x - mu), axis=-1, keepdims=True)
    return (x - mu) * lax.rsqrt(var + LN_EPS) * gamma + beta


def sakt_kernel(num_heads,
                m_ref, e_ref, a1_ref, p_ref,
                w_at2, b_at2, w_v, b_v,
                wq, bq, w_kv, b_kv, wo, bo,
                ln1_g, ln1_b, w1, b1, w2, b2, ln2_g, ln2_b, wp, bp,
                p_out, attn_out):
    M = m_ref[0]            # (N, D)       interaction embedding M(x)
    E = e_ref[0]            # (N, D)       query embedding E(qry)
    A1 = a1_ref[0]          # (BERT_LEN, D) pre-projected BERT features (W_at + b_at folded)
    P = p_ref[...]          # (N, D)       positional parameter

    n, d = M.shape
    hd = d // num_heads
    scale = 1.0 / float(hd) ** 0.5

    # --- at2_emb_layer applied to A1.T: contract the 512 axis directly
    #     (dot_general with lhs dim-0 contraction; no explicit transpose).
    A = lax.dot_general(A1, w_at2[...], (((0,), (0,)), ((), ())),
                        preferred_element_type=jnp.float32) + b_at2[...]      # (D, D)

    # --- V = relu(v_emb_layer(concat([M, A], -1)))
    MV = jnp.concatenate([M, A], axis=-1)                                     # (N, 2D)
    V = jnp.maximum(
        jnp.dot(MV, w_v[...], preferred_element_type=jnp.float32) + b_v[...], 0.0)

    Mt = M + P + V                                                            # (N, D)

    # --- MultiheadAttention(E, Mt, Mt, causal mask) -------------------------
    q = jnp.dot(E, wq[...], preferred_element_type=jnp.float32) + bq[...]     # (N, D)
    kv = jnp.dot(Mt, w_kv[...], preferred_element_type=jnp.float32) + b_kv[...]  # (N, 2D)
    k = kv[:, :d]
    v = kv[:, d:]

    # Stack heads -> single batched contraction (replaces the per-head loop).
    q3 = jnp.stack([q[:, h * hd:(h + 1) * hd] for h in range(num_heads)], axis=0)  # (H,N,hd)
    k3 = jnp.stack([k[:, h * hd:(h + 1) * hd] for h in range(num_heads)], axis=0)
    v3 = jnp.stack([v[:, h * hd:(h + 1) * hd] for h in range(num_heads)], axis=0)

    row = lax.broadcasted_iota(jnp.int32, (n, n), 0)
    col = lax.broadcasted_iota(jnp.int32, (n, n), 1)
    causal = (col > row)[None]                     # triu(ones, diagonal=1), broadcast over heads

    s = jnp.einsum('hqd,hkd->hqk', q3, k3,
                   preferred_element_type=jnp.float32) * scale                # (H, N, N)
    s = jnp.where(causal, -1e30, s)
    s = s - jnp.max(s, axis=-1, keepdims=True)
    p_h = jnp.exp(s)
    # approx=True -> EUP vrcp (idle slot); ~1e-3 rel error, fine for inference.
    p_h = p_h * pl.reciprocal(jnp.sum(p_h, axis=-1, keepdims=True), approx=True)

    ctx = jnp.einsum('hqk,hkd->hqd', p_h, v3,
                     preferred_element_type=jnp.float32)                      # (H, N, hd)
    ctx = jnp.concatenate([ctx[h] for h in range(num_heads)], axis=-1)        # (N, D)

    S = jnp.dot(ctx, wo[...], preferred_element_type=jnp.float32) + bo[...]   # (N, D)
    attn_w = jnp.sum(p_h, axis=0) * (1.0 / num_heads)   # averaged over heads (PyTorch default)

    # --- residual + layer norms + FFN + prediction ---------------------------
    S = _layer_norm(S + Mt + E, ln1_g[...], ln1_b[...])

    Fh = jnp.maximum(jnp.dot(S, w1[...], preferred_element_type=jnp.float32) + b1[...], 0.0)
    Fo = jnp.dot(Fh, w2[...], preferred_element_type=jnp.float32) + b2[...]
    Fo = _layer_norm(Fo + S, ln2_g[...], ln2_b[...])

    logit = jnp.dot(Fo, wp[...], preferred_element_type=jnp.float32) + bp[...]  # (N, 1)
    p_out[0] = jax.nn.sigmoid(logit)
    attn_out[0] = attn_w


def _batch_spec(shape):
    nd = len(shape)
    return pl.BlockSpec((1,) + shape, lambda b, _nd=nd: (b,) + (0,) * _nd)


def _shared_spec(shape):
    nd = len(shape)
    return pl.BlockSpec(shape, lambda b, _nd=nd: (0,) * _nd)


def sakt_forward(params, q, r, qry, at_s, at_t, at_m):
    del at_t, at_m  # only consumed by the real BERT encoder (see TODO above)
    x = q + NUM_Q * r
    M_seq = params["M_table"][x]              # (B, N, D)   Embedding lookup (glue)
    E_seq = params["E_table"][qry]            # (B, N, D)

    # Hoist at_emb_layer onto the 64-row BERT stand-in table, then gather:
    # exact because the stand-in is a lookup followed by an affine layer.
    proj_table = (jnp.dot(params["bert_table"], params["W_at"])
                  + params["b_at"])           # (BERT_VOCAB, D)
    A1_seq = proj_table[at_s]                 # (B, BERT_LEN, D)  -- 64 KiB/batch vs 1.5 MiB

    # Fuse K and V projections into one matmul weight.
    w_kv = jnp.concatenate([params["Wk"], params["Wv"]], axis=1)   # (D, 2D)
    b_kv = jnp.concatenate([params["bk"], params["bv"]], axis=1)   # (1, 2D)

    weights = [
        params["W_at2"], params["b_at2"], params["W_v"], params["b_v"],
        params["Wq"], params["bq"], w_kv, b_kv, params["Wo"], params["bo"],
        params["ln1_g"], params["ln1_b"], params["W1"], params["b1"],
        params["W2"], params["b2"], params["ln2_g"], params["ln2_b"],
        params["Wp"], params["bp"],
    ]

    in_specs = [
        _batch_spec((N, D)),            # M_seq
        _batch_spec((N, D)),            # E_seq
        _batch_spec((BERT_LEN, D)),     # pre-projected BERT features
        _shared_spec((N, D)),           # P
    ] + [_shared_spec(w.shape) for w in weights]

    out_shapes = (
        jax.ShapeDtypeStruct((B, N, 1), jnp.float32),   # p (squeezed later)
        jax.ShapeDtypeStruct((B, N, N), jnp.float32),   # attn_weights
    )
    out_specs = (_batch_spec((N, 1)), _batch_spec((N, N)))

    p3, attn_w = pl.pallas_call(
        functools.partial(sakt_kernel, NUM_HEADS),
        out_shape=out_shapes,
        grid_spec=pltpu.PrefetchScalarGridSpec(
            num_scalar_prefetch=0,
            grid=(B,),
            in_specs=in_specs,
            out_specs=out_specs,
        ),
        compiler_params=pltpu.CompilerParams(
            # no cross-iteration state -> shard batch across TCs on v7x
            dimension_semantics=("parallel",),
            vmem_limit_bytes=16 << 20,
        ),
    )(M_seq, E_seq, A1_seq, params["P"], *weights)

    return p3[..., 0], attn_w


def init_params(key):
    ks = iter(jax.random.split(key, 32))

    def w(shape, scale=0.02):
        return (scale * jax.random.normal(next(ks), shape)).astype(jnp.float32)

    params = {
        "M_table": w((NUM_Q * 2, D), 1.0),
        "E_table": w((NUM_Q, D), 1.0),
        "P": w((N, D), (2.0 / D) ** 0.5),               # kaiming_normal_
        "bert_table": w((BERT_VOCAB, BERT_HID), 0.1),   # BERT stand-in
        # Linear layers, stored (in, out); bias as (1, out)
        "W_at": w((BERT_HID, D)), "b_at": jnp.zeros((1, D), jnp.float32),
        "W_at2": w((BERT_LEN, D)), "b_at2": jnp.zeros((1, D), jnp.float32),
        "W_v": w((2 * D, D)), "b_v": jnp.zeros((1, D), jnp.float32),
        # MultiheadAttention projections
        "Wq": w((D, D)), "bq": jnp.zeros((1, D), jnp.float32),
        "Wk": w((D, D)), "bk": jnp.zeros((1, D), jnp.float32),
        "Wv": w((D, D)), "bv": jnp.zeros((1, D), jnp.float32),
        "Wo": w((D, D)), "bo": jnp.zeros((1, D), jnp.float32),
        "ln1_g": jnp.ones((1, D), jnp.float32), "ln1_b": jnp.zeros((1, D), jnp.float32),
        # FFN
        "W1": w((D, D)), "b1": jnp.zeros((1, D), jnp.float32),
        "W2": w((D, D)), "b2": jnp.zeros((1, D), jnp.float32),
        "ln2_g": jnp.ones((1, D), jnp.float32), "ln2_b": jnp.zeros((1, D), jnp.float32),
        # prediction head
        "Wp": w((D, 1)), "bp": jnp.zeros((1, 1), jnp.float32),
    }
    return params


if __name__ == "__main__":
    key = jax.random.PRNGKey(0)
    kp, kq, kr, kqry, ks, kt = jax.random.split(key, 6)

    params = init_params(kp)

    q = jax.random.randint(kq, (B, N), 0, NUM_Q, dtype=jnp.int32)
    r = jax.random.randint(kr, (B, N), 0, 2, dtype=jnp.int32)
    qry = jax.random.randint(kqry, (B, N), 0, NUM_Q, dtype=jnp.int32)
    at_s = jax.random.randint(ks, (B, BERT_LEN), 0, BERT_VOCAB, dtype=jnp.int32)
    at_t = jnp.ones((B, BERT_LEN), jnp.int32)   # attention mask (unused by stand-in)
    at_m = jnp.zeros((B, BERT_LEN), jnp.int32)  # token type ids (unused by stand-in)

    p, attn_weights = jax.jit(sakt_forward)(params, q, r, qry, at_s, at_t, at_m)
    jax.block_until_ready((p, attn_weights))

    assert p.shape == (B, N) and attn_weights.shape == (B, N, N)
    assert bool(jnp.all(jnp.isfinite(p))) and bool(jnp.all(jnp.isfinite(attn_weights)))
    print("KERNEL_OK")
</pallas_src>

<mosaic_0001>
module attributes {stable_mosaic.version = 11 : i64} {
  func.func @sakt_kernel(%arg0: i32, %arg1: memref<1x32x32xf32, #tpu.memory_space<vmem>>, %arg2: memref<1x32x32xf32, #tpu.memory_space<vmem>>, %arg3: memref<1x512x32xf32, #tpu.memory_space<vmem>>, %arg4: memref<32x32xf32, #tpu.memory_space<vmem>>, %arg5: memref<512x32xf32, #tpu.memory_space<vmem>>, %arg6: memref<1x32xf32, #tpu.memory_space<vmem>>, %arg7: memref<64x32xf32, #tpu.memory_space<vmem>>, %arg8: memref<1x32xf32, #tpu.memory_space<vmem>>, %arg9: memref<32x32xf32, #tpu.memory_space<vmem>>, %arg10: memref<1x32xf32, #tpu.memory_space<vmem>>, %arg11: memref<32x64xf32, #tpu.memory_space<vmem>>, %arg12: memref<1x64xf32, #tpu.memory_space<vmem>>, %arg13: memref<32x32xf32, #tpu.memory_space<vmem>>, %arg14: memref<1x32xf32, #tpu.memory_space<vmem>>, %arg15: memref<1x32xf32, #tpu.memory_space<vmem>>, %arg16: memref<1x32xf32, #tpu.memory_space<vmem>>, %arg17: memref<32x32xf32, #tpu.memory_space<vmem>>, %arg18: memref<1x32xf32, #tpu.memory_space<vmem>>, %arg19: memref<32x32xf32, #tpu.memory_space<vmem>>, %arg20: memref<1x32xf32, #tpu.memory_space<vmem>>, %arg21: memref<1x32xf32, #tpu.memory_space<vmem>>, %arg22: memref<1x32xf32, #tpu.memory_space<vmem>>, %arg23: memref<32x1xf32, #tpu.memory_space<vmem>>, %arg24: memref<1x1xf32, #tpu.memory_space<vmem>>, %arg25: memref<1x32x1xf32, #tpu.memory_space<vmem>>, %arg26: memref<1x32x32xf32, #tpu.memory_space<vmem>>) attributes {dimension_semantics = [#tpu.dimension_semantics<parallel>], iteration_bounds = array<i64: 2>, scalar_prefetch = 0 : i64, scratch_operands = 0 : i64, tpu.core_type = #tpu.core_type<tc>, window_params = [{transform_indices = @transform_0, window_bounds = array<i64: 1, 32, 32>}, {transform_indices = @transform_1, window_bounds = array<i64: 1, 32, 32>}, {transform_indices = @transform_2, window_bounds = array<i64: 1, 512, 32>}, {pipeline_mode = #tpu.pipeline_mode<synchronous>, transform_indices = @transform_3, window_bounds = array<i64: 32, 32>}, {pipeline_mode = #tpu.pipeline_mode<synchronous>, transform_indices = @transform_4, window_bounds = array<i64: 512, 32>}, {pipeline_mode = #tpu.pipeline_mode<synchronous>, transform_indices = @transform_5, window_bounds = array<i64: 1, 32>}, {pipeline_mode = #tpu.pipeline_mode<synchronous>, transform_indices = @transform_6, window_bounds = array<i64: 64, 32>}, {pipeline_mode = #tpu.pipeline_mode<synchronous>, transform_indices = @transform_7, window_bounds = array<i64: 1, 32>}, {pipeline_mode = #tpu.pipeline_mode<synchronous>, transform_indices = @transform_8, window_bounds = array<i64: 32, 32>}, {pipeline_mode = #tpu.pipeline_mode<synchronous>, transform_indices = @transform_9, window_bounds = array<i64: 1, 32>}, {pipeline_mode = #tpu.pipeline_mode<synchronous>, transform_indices = @transform_10, window_bounds = array<i64: 32, 64>}, {pipeline_mode = #tpu.pipeline_mode<synchronous>, transform_indices = @transform_11, window_bounds = array<i64: 1, 64>}, {pipeline_mode = #tpu.pipeline_mode<synchronous>, transform_indices = @transform_12, window_bounds = array<i64: 32, 32>}, {pipeline_mode = #tpu.pipeline_mode<synchronous>, transform_indices = @transform_13, window_bounds = array<i64: 1, 32>}, {pipeline_mode = #tpu.pipeline_mode<synchronous>, transform_indices = @transform_14, window_bounds = array<i64: 1, 32>}, {pipeline_mode = #tpu.pipeline_mode<synchronous>, transform_indices = @transform_15, window_bounds = array<i64: 1, 32>}, {pipeline_mode = #tpu.pipeline_mode<synchronous>, transform_indices = @transform_16, window_bounds = array<i64: 32, 32>}, {pipeline_mode = #tpu.pipeline_mode<synchronous>, transform_indices = @transform_17, window_bounds = array<i64: 1, 32>}, {pipeline_mode = #tpu.pipeline_mode<synchronous>, transform_indices = @transform_18, window_bounds = array<i64: 32, 32>}, {pipeline_mode = #tpu.pipeline_mode<synchronous>, transform_indices = @transform_19, window_bounds = array<i64: 1, 32>}, {pipeline_mode = #tpu.pipeline_mode<synchronous>, transform_indices = @transform_20, window_bounds = array<i64: 1, 32>}, {pipeline_mode = #tpu.pipeline_mode<synchronous>, transform_indices = @transform_21, window_bounds = array<i64: 1, 32>}, {pipeline_mode = #tpu.pipeline_mode<synchronous>, transform_indices = @transform_22, window_bounds = array<i64: 32, 1>}, {pipeline_mode = #tpu.pipeline_mode<synchronous>, transform_indices = @transform_23, window_bounds = array<i64: 1, 1>}, {transform_indices = @transform_24, window_bounds = array<i64: 1, 32, 1>}, {transform_indices = @transform_25, window_bounds = array<i64: 1, 32, 32>}]} {
    %c0 = arith.constant 0 : index
    %c0_0 = arith.constant 0 : index
    %c0_1 = arith.constant 0 : index
    %0 = vector.load %arg1[%c0, %c0_0, %c0_1] : memref<1x32x32xf32, #tpu.memory_space<vmem>>, vector<1x32x32xf32>
    %1 = vector.shape_cast %0 : vector<1x32x32xf32> to vector<32x32xf32>
    %c0_2 = arith.constant 0 : index
    %c0_3 = arith.constant 0 : index
    %c0_4 = arith.constant 0 : index
    %2 = vector.load %arg2[%c0_2, %c0_3, %c0_4] : memref<1x32x32xf32, #tpu.memory_space<vmem>>, vector<1x32x32xf32>
    %3 = vector.shape_cast %2 : vector<1x32x32xf32> to vector<32x32xf32>
    %c0_5 = arith.constant 0 : index
    %c0_6 = arith.constant 0 : index
    %c0_7 = arith.constant 0 : index
    %4 = vector.load %arg3[%c0_5, %c0_6, %c0_7] : memref<1x512x32xf32, #tpu.memory_space<vmem>>, vector<1x512x32xf32>
    %5 = vector.shape_cast %4 : vector<1x512x32xf32> to vector<512x32xf32>
    %c0_8 = arith.constant 0 : index
    %c0_9 = arith.constant 0 : index
    %6 = vector.load %arg4[%c0_8, %c0_9] : memref<32x32xf32, #tpu.memory_space<vmem>>, vector<32x32xf32>
    %c0_10 = arith.constant 0 : index
    %c0_11 = arith.constant 0 : index
    %7 = vector.load %arg5[%c0_10, %c0_11] : memref<512x32xf32, #tpu.memory_space<vmem>>, vector<512x32xf32>
    %cst = arith.constant dense<0.000000e+00> : vector<32x32xf32>
    %8 = tpu.matmul %5, %7, %cst {dimension_numbers = #tpu.dot_dimension_numbers<[0], [0], [1], [1], [0, 1, 1, 1], [], []>} : vector<512x32xf32>, vector<512x32xf32>, vector<32x32xf32> -> vector<32x32xf32>
    %c0_12 = arith.constant 0 : index
    %c0_13 = arith.constant 0 : index
    %9 = vector.load %arg6[%c0_12, %c0_13] : memref<1x32xf32, #tpu.memory_space<vmem>>, vector<1x32xf32>
    %10 = vector.broadcast %9 : vector<1x32xf32> to vector<32x32xf32>
    %11 = arith.addf %8, %10 : vector<32x32xf32>
    %12 = tpu.concatenate %1, %11 in 1 : vector<32x32xf32>, vector<32x32xf32> -> vector<32x64xf32>
    %c0_14 = arith.constant 0 : index
    %c0_15 = arith.constant 0 : index
    %13 = vector.load %arg7[%c0_14, %c0_15] : memref<64x32xf32, #tpu.memory_space<vmem>>, vector<64x32xf32>
    %cst_16 = arith.constant dense<0.000000e+00> : vector<32x32xf32>
    %14 = tpu.matmul %12, %13, %cst_16 {dimension_numbers = #tpu.dot_dimension_numbers<[1], [0], [0], [1], [0, 0, 1, 1], [], []>} : vector<32x64xf32>, vector<64x32xf32>, vector<32x32xf32> -> vector<32x32xf32>
    %c0_17 = arith.constant 0 : index
    %c0_18 = arith.constant 0 : index
    %15 = vector.load %arg8[%c0_17, %c0_18] : memref<1x32xf32, #tpu.memory_space<vmem>>, vector<1x32xf32>
    %16 = vector.broadcast %15 : vector<1x32xf32> to vector<32x32xf32>
    %17 = arith.addf %14, %16 : vector<32x32xf32>
    %cst_19 = arith.constant 0.000000e+00 : f32
    %18 = vector.broadcast %cst_19 : f32 to vector<32x32xf32>
    %19 = arith.maximumf %17, %18 : vector<32x32xf32>
    %20 = arith.addf %1, %6 : vector<32x32xf32>
    %21 = arith.addf %20, %19 : vector<32x32xf32>
    %c0_20 = arith.constant 0 : index
    %c0_21 = arith.constant 0 : index
    %22 = vector.load %arg9[%c0_20, %c0_21] : memref<32x32xf32, #tpu.memory_space<vmem>>, vector<32x32xf32>
    %cst_22 = arith.constant dense<0.000000e+00> : vector<32x32xf32>
    %23 = tpu.matmul %3, %22, %cst_22 {dimension_numbers = #tpu.dot_dimension_numbers<[1], [0], [0], [1], [0, 0, 1, 1], [], []>} : vector<32x32xf32>, vector<32x32xf32>, vector<32x32xf32> -> vector<32x32xf32>
    %c0_23 = arith.constant 0 : index
    %c0_24 = arith.constant 0 : index
    %24 = vector.load %arg10[%c0_23, %c0_24] : memref<1x32xf32, #tpu.memory_space<vmem>>, vector<1x32xf32>
    %25 = vector.broadcast %24 : vector<1x32xf32> to vector<32x32xf32>
    %26 = arith.addf %23, %25 : vector<32x32xf32>
    %c0_25 = arith.constant 0 : index
    %c0_26 = arith.constant 0 : index
    %27 = vector.load %arg11[%c0_25, %c0_26] : memref<32x64xf32, #tpu.memory_space<vmem>>, vector<32x64xf32>
    %cst_27 = arith.constant dense<0.000000e+00> : vector<32x64xf32>
    %28 = tpu.matmul %21, %27, %cst_27 {dimension_numbers = #tpu.dot_dimension_numbers<[1], [0], [0], [1], [0, 0, 1, 1], [], []>} : vector<32x32xf32>, vector<32x64xf32>, vector<32x64xf32> -> vector<32x64xf32>
    %c0_28 = arith.constant 0 : index
    %c0_29 = arith.constant 0 : index
    %29 = vector.load %arg12[%c0_28, %c0_29] : memref<1x64xf32, #tpu.memory_space<vmem>>, vector<1x64xf32>
    %30 = vector.broadcast %29 : vector<1x64xf32> to vector<32x64xf32>
    %31 = arith.addf %28, %30 : vector<32x64xf32>
    %32 = vector.extract_strided_slice %31 {offsets = [0, 0], sizes = [32, 32], strides = [1, 1]} : vector<32x64xf32> to vector<32x32xf32>
    %33 = vector.extract_strided_slice %31 {offsets = [0, 32], sizes = [32, 32], strides = [1, 1]} : vector<32x64xf32> to vector<32x32xf32>
    %34 = vector.extract_strided_slice %26 {offsets = [0, 0], sizes = [32, 8], strides = [1, 1]} : vector<32x32xf32> to vector<32x8xf32>
    %35 = vector.extract_strided_slice %26 {offsets = [0, 8], sizes = [32, 8], strides = [1, 1]} : vector<32x32xf32> to vector<32x8xf32>
    %36 = vector.extract_strided_slice %26 {offsets = [0, 16], sizes = [32, 8], strides = [1, 1]} : vector<32x32xf32> to vector<32x8xf32>
    %37 = vector.extract_strided_slice %26 {offsets = [0, 24], sizes = [32, 8], strides = [1, 1]} : vector<32x32xf32> to vector<32x8xf32>
    %38 = vector.shape_cast %34 : vector<32x8xf32> to vector<1x32x8xf32>
    %39 = vector.shape_cast %35 : vector<32x8xf32> to vector<1x32x8xf32>
    %40 = vector.shape_cast %36 : vector<32x8xf32> to vector<1x32x8xf32>
    %41 = vector.shape_cast %37 : vector<32x8xf32> to vector<1x32x8xf32>
    %42 = tpu.concatenate %38, %39, %40, %41 in 0 : vector<1x32x8xf32>, vector<1x32x8xf32>, vector<1x32x8xf32>, vector<1x32x8xf32> -> vector<4x32x8xf32>
    %43 = vector.extract_strided_slice %32 {offsets = [0, 0], sizes = [32, 8], strides = [1, 1]} : vector<32x32xf32> to vector<32x8xf32>
    %44 = vector.extract_strided_slice %32 {offsets = [0, 8], sizes = [32, 8], strides = [1, 1]} : vector<32x32xf32> to vector<32x8xf32>
    %45 = vector.extract_strided_slice %32 {offsets = [0, 16], sizes = [32, 8], strides = [1, 1]} : vector<32x32xf32> to vector<32x8xf32>
    %46 = vector.extract_strided_slice %32 {offsets = [0, 24], sizes = [32, 8], strides = [1, 1]} : vector<32x32xf32> to vector<32x8xf32>
    %47 = vector.shape_cast %43 : vector<32x8xf32> to vector<1x32x8xf32>
    %48 = vector.shape_cast %44 : vector<32x8xf32> to vector<1x32x8xf32>
    %49 = vector.shape_cast %45 : vector<32x8xf32> to vector<1x32x8xf32>
    %50 = vector.shape_cast %46 : vector<32x8xf32> to vector<1x32x8xf32>
    %51 = tpu.concatenate %47, %48, %49, %50 in 0 : vector<1x32x8xf32>, vector<1x32x8xf32>, vector<1x32x8xf32>, vector<1x32x8xf32> -> vector<4x32x8xf32>
    %52 = vector.extract_strided_slice %33 {offsets = [0, 0], sizes = [32, 8], strides = [1, 1]} : vector<32x32xf32> to vector<32x8xf32>
    %53 = vector.extract_strided_slice %33 {offsets = [0, 8], sizes = [32, 8], strides = [1, 1]} : vector<32x32xf32> to vector<32x8xf32>
    %54 = vector.extract_strided_slice %33 {offsets = [0, 16], sizes = [32, 8], strides = [1, 1]} : vector<32x32xf32> to vector<32x8xf32>
    %55 = vector.extract_strided_slice %33 {offsets = [0, 24], sizes = [32, 8], strides = [1, 1]} : vector<32x32xf32> to vector<32x8xf32>
    %56 = vector.shape_cast %52 : vector<32x8xf32> to vector<1x32x8xf32>
    %57 = vector.shape_cast %53 : vector<32x8xf32> to vector<1x32x8xf32>
    %58 = vector.shape_cast %54 : vector<32x8xf32> to vector<1x32x8xf32>
    %59 = vector.shape_cast %55 : vector<32x8xf32> to vector<1x32x8xf32>
    %60 = tpu.concatenate %56, %57, %58, %59 in 0 : vector<1x32x8xf32>, vector<1x32x8xf32>, vector<1x32x8xf32>, vector<1x32x8xf32> -> vector<4x32x8xf32>
    %61 = tpu.iota {dimensions = array<i32: 0>} : vector<32x32xi32>
    %62 = tpu.iota {dimensions = array<i32: 1>} : vector<32x32xi32>
    %63 = arith.cmpi sgt, %62, %61 : vector<32x32xi32>
    %64 = vector.shape_cast %63 : vector<32x32xi1> to vector<1x32x32xi1>
    "tpu.trace_start"() <{level = 10 : i32, message = "hqd,hkd->hqk"}> : () -> ()
    %cst_30 = arith.constant dense<0.000000e+00> : vector<4x32x32xf32>
    %65 = tpu.matmul %42, %51, %cst_30 {dimension_numbers = #tpu.dot_dimension_numbers<[2], [2], [1], [1], [0, 0, 0, 1, 1, 1], [0], [0]>} : vector<4x32x8xf32>, vector<4x32x8xf32>, vector<4x32x32xf32> -> vector<4x32x32xf32>
    "tpu.trace_stop"() : () -> ()
    %cst_31 = arith.constant 0.353553385 : f32
    %66 = vector.broadcast %cst_31 : f32 to vector<4x32x32xf32>
    %67 = arith.mulf %65, %66 : vector<4x32x32xf32>
    %cst_32 = arith.constant -1.000000e+30 : f32
    %68 = vector.shape_cast %64 : vector<1x32x32xi1> to vector<1x32x32xi1>
    %69 = vector.broadcast %68 : vector<1x32x32xi1> to vector<4x32x32xi1>
    %70 = vector.broadcast %cst_32 : f32 to vector<4x32x32xf32>
    %71 = arith.select %69, %70, %67 : vector<4x32x32xi1>, vector<4x32x32xf32>
    %cst_33 = arith.constant dense<0xFF800000> : vector<4x32xf32>
    %72 = vector.multi_reduction <maximumf>, %71, %cst_33 [2] : vector<4x32x32xf32> to vector<4x32xf32>
    %73 = vector.shape_cast %72 : vector<4x32xf32> to vector<4x32x1xf32>
    %74 = vector.broadcast %73 : vector<4x32x1xf32> to vector<4x32x32xf32>
    %75 = arith.subf %71, %74 : vector<4x32x32xf32>
    %76 = math.exp %75 : vector<4x32x32xf32>
    %cst_34 = arith.constant dense<0.000000e+00> : vector<4x32xf32>
    %77 = vector.multi_reduction <add>, %76, %cst_34 [2] : vector<4x32x32xf32> to vector<4x32xf32>
    %78 = vector.shape_cast %77 : vector<4x32xf32> to vector<4x32x1xf32>
    %79 = tpu.reciprocal %78 {approx = true} : vector<4x32x1xf32> -> vector<4x32x1xf32>
    %80 = vector.broadcast %79 : vector<4x32x1xf32> to vector<4x32x32xf32>
    %81 = arith.mulf %76, %80 : vector<4x32x32xf32>
    "tpu.trace_start"() <{level = 10 : i32, message = "hqk,hkd->hqd"}> : () -> ()
    %cst_35 = arith.constant dense<0.000000e+00> : vector<4x32x8xf32>
    %82 = tpu.matmul %81, %60, %cst_35 {dimension_numbers = #tpu.dot_dimension_numbers<[2], [1], [1], [2], [0, 0, 0, 1, 1, 2], [0], [0]>} : vector<4x32x32xf32>, vector<4x32x8xf32>, vector<4x32x8xf32> -> vector<4x32x8xf32>
    "tpu.trace_stop"() : () -> ()
    %83 = vector.extract_strided_slice %82 {offsets = [0, 0, 0], sizes = [1, 32, 8], strides = [1, 1, 1]} : vector<4x32x8xf32> to vector<1x32x8xf32>
    %84 = vector.shape_cast %83 : vector<1x32x8xf32> to vector<32x8xf32>
    %85 = vector.extract_strided_slice %82 {offsets = [1, 0, 0], sizes = [1, 32, 8], strides = [1, 1, 1]} : vector<4x32x8xf32> to vector<1x32x8xf32>
    %86 = vector.shape_cast %85 : vector<1x32x8xf32> to vector<32x8xf32>
    %87 = vector.extract_strided_slice %82 {offsets = [2, 0, 0], sizes = [1, 32, 8], strides = [1, 1, 1]} : vector<4x32x8xf32> to vector<1x32x8xf32>
    %88 = vector.shape_cast %87 : vector<1x32x8xf32> to vector<32x8xf32>
    %89 = vector.extract_strided_slice %82 {offsets = [3, 0, 0], sizes = [1, 32, 8], strides = [1, 1, 1]} : vector<4x32x8xf32> to vector<1x32x8xf32>
    %90 = vector.shape_cast %89 : vector<1x32x8xf32> to vector<32x8xf32>
    %91 = tpu.concatenate %84, %86, %88, %90 in 1 : vector<32x8xf32>, vector<32x8xf32>, vector<32x8xf32>, vector<32x8xf32> -> vector<32x32xf32>
    %c0_36 = arith.constant 0 : index
    %c0_37 = arith.constant 0 : index
    %92 = vector.load %arg13[%c0_36, %c0_37] : memref<32x32xf32, #tpu.memory_space<vmem>>, vector<32x32xf32>
    %cst_38 = arith.constant dense<0.000000e+00> : vector<32x32xf32>
    %93 = tpu.matmul %91, %92, %cst_38 {dimension_numbers = #tpu.dot_dimension_numbers<[1], [0], [0], [1], [0, 0, 1, 1], [], []>} : vector<32x32xf32>, vector<32x32xf32>, vector<32x32xf32> -> vector<32x32xf32>
    %c0_39 = arith.constant 0 : index
    %c0_40 = arith.constant 0 : index
    %94 = vector.load %arg14[%c0_39, %c0_40] : memref<1x32xf32, #tpu.memory_space<vmem>>, vector<1x32xf32>
    %95 = vector.broadcast %94 : vector<1x32xf32> to vector<32x32xf32>
    %96 = arith.addf %93, %95 : vector<32x32xf32>
    %cst_41 = arith.constant dense<0.000000e+00> : vector<32x32xf32>
    %97 = vector.multi_reduction <add>, %81, %cst_41 [0] : vector<4x32x32xf32> to vector<32x32xf32>
    %cst_42 = arith.constant 2.500000e-01 : f32
    %98 = vector.broadcast %cst_42 : f32 to vector<32x32xf32>
    %99 = arith.mulf %97, %98 : vector<32x32xf32>
    %100 = arith.addf %96, %21 : vector<32x32xf32>
    %101 = arith.addf %100, %3 : vector<32x32xf32>
    %c0_43 = arith.constant 0 : index
    %c0_44 = arith.constant 0 : index
    %102 = vector.load %arg15[%c0_43, %c0_44] : memref<1x32xf32, #tpu.memory_space<vmem>>, vector<1x32xf32>
    %c0_45 = arith.constant 0 : index
    %c0_46 = arith.constant 0 : index
    %103 = vector.load %arg16[%c0_45, %c0_46] : memref<1x32xf32, #tpu.memory_space<vmem>>, vector<1x32xf32>
    %cst_47 = arith.constant dense<0.000000e+00> : vector<32xf32>
    %104 = vector.multi_reduction <add>, %101, %cst_47 [1] : vector<32x32xf32> to vector<32xf32>
    %105 = vector.shape_cast %104 : vector<32xf32> to vector<32x1xf32>
    %cst_48 = arith.constant 3.200000e+01 : f32
    %106 = vector.broadcast %cst_48 : f32 to vector<32x1xf32>
    %107 = arith.divf %105, %106 : vector<32x1xf32>
    %108 = vector.broadcast %107 : vector<32x1xf32> to vector<32x32xf32>
    %109 = arith.subf %101, %108 : vector<32x32xf32>
    %110 = vector.broadcast %107 : vector<32x1xf32> to vector<32x32xf32>
    %111 = arith.subf %101, %110 : vector<32x32xf32>
    %112 = arith.mulf %109, %111 : vector<32x32xf32>
    %cst_49 = arith.constant dense<0.000000e+00> : vector<32xf32>
    %113 = vector.multi_reduction <add>, %112, %cst_49 [1] : vector<32x32xf32> to vector<32xf32>
    %114 = vector.shape_cast %113 : vector<32xf32> to vector<32x1xf32>
    %cst_50 = arith.constant 3.200000e+01 : f32
    %115 = vector.broadcast %cst_50 : f32 to vector<32x1xf32>
    %116 = arith.divf %114, %115 : vector<32x1xf32>
    %117 = vector.broadcast %107 : vector<32x1xf32> to vector<32x32xf32>
    %118 = arith.subf %101, %117 : vector<32x32xf32>
    %cst_51 = arith.constant 9.99999974E-6 : f32
    %119 = vector.broadcast %cst_51 : f32 to vector<32x1xf32>
    %120 = arith.addf %116, %119 : vector<32x1xf32>
    %121 = math.rsqrt %120 : vector<32x1xf32>
    %122 = vector.broadcast %121 : vector<32x1xf32> to vector<32x32xf32>
    %123 = arith.mulf %118, %122 : vector<32x32xf32>
    %124 = vector.broadcast %102 : vector<1x32xf32> to vector<32x32xf32>
    %125 = arith.mulf %123, %124 : vector<32x32xf32>
    %126 = vector.broadcast %103 : vector<1x32xf32> to vector<32x32xf32>
    %127 = arith.addf %125, %126 : vector<32x32xf32>
    %c0_52 = arith.constant 0 : index
    %c0_53 = arith.constant 0 : index
    %128 = vector.load %arg17[%c0_52, %c0_53] : memref<32x32xf32, #tpu.memory_space<vmem>>, vector<32x32xf32>
    %cst_54 = arith.constant dense<0.000000e+00> : vector<32x32xf32>
    %129 = tpu.matmul %127, %128, %cst_54 {dimension_numbers = #tpu.dot_dimension_numbers<[1], [0], [0], [1], [0, 0, 1, 1], [], []>} : vector<32x32xf32>, vector<32x32xf32>, vector<32x32xf32> -> vector<32x32xf32>
    %c0_55 = arith.constant 0 : index
    %c0_56 = arith.constant 0 : index
    %130 = vector.load %arg18[%c0_55, %c0_56] : memref<1x32xf32, #tpu.memory_space<vmem>>, vector<1x32xf32>
    %131 = vector.broadcast %130 : vector<1x32xf32> to vector<32x32xf32>
    %132 = arith.addf %129, %131 : vector<32x32xf32>
    %cst_57 = arith.constant 0.000000e+00 : f32
    %133 = vector.broadcast %cst_57 : f32 to vector<32x32xf32>
    %134 = arith.maximumf %132, %133 : vector<32x32xf32>
    %c0_58 = arith.constant 0 : index
    %c0_59 = arith.constant 0 : index
    %135 = vector.load %arg19[%c0_58, %c0_59] : memref<32x32xf32, #tpu.memory_space<vmem>>, vector<32x32xf32>
    %cst_60 = arith.constant dense<0.000000e+00> : vector<32x32xf32>
    %136 = tpu.matmul %134, %135, %cst_60 {dimension_numbers = #tpu.dot_dimension_numbers<[1], [0], [0], [1], [0, 0, 1, 1], [], []>} : vector<32x32xf32>, vector<32x32xf32>, vector<32x32xf32> -> vector<32x32xf32>
    %c0_61 = arith.constant 0 : index
    %c0_62 = arith.constant 0 : index
    %137 = vector.load %arg20[%c0_61, %c0_62] : memref<1x32xf32, #tpu.memory_space<vmem>>, vector<1x32xf32>
    %138 = vector.broadcast %137 : vector<1x32xf32> to vector<32x32xf32>
    %139 = arith.addf %136, %138 : vector<32x32xf32>
    %140 = arith.addf %139, %127 : vector<32x32xf32>
    %c0_63 = arith.constant 0 : index
    %c0_64 = arith.constant 0 : index
    %141 = vector.load %arg21[%c0_63, %c0_64] : memref<1x32xf32, #tpu.memory_space<vmem>>, vector<1x32xf32>
    %c0_65 = arith.constant 0 : index
    %c0_66 = arith.constant 0 : index
    %142 = vector.load %arg22[%c0_65, %c0_66] : memref<1x32xf32, #tpu.memory_space<vmem>>, vector<1x32xf32>
    %cst_67 = arith.constant dense<0.000000e+00> : vector<32xf32>
    %143 = vector.multi_reduction <add>, %140, %cst_67 [1] : vector<32x32xf32> to vector<32xf32>
    %144 = vector.shape_cast %143 : vector<32xf32> to vector<32x1xf32>
    %cst_68 = arith.constant 3.200000e+01 : f32
    %145 = vector.broadcast %cst_68 : f32 to vector<32x1xf32>
    %146 = arith.divf %144, %145 : vector<32x1xf32>
    %147 = vector.broadcast %146 : vector<32x1xf32> to vector<32x32xf32>
    %148 = arith.subf %140, %147 : vector<32x32xf32>
    %149 = vector.broadcast %146 : vector<32x1xf32> to vector<32x32xf32>
    %150 = arith.subf %140, %149 : vector<32x32xf32>
    %151 = arith.mulf %148, %150 : vector<32x32xf32>
    %cst_69 = arith.constant dense<0.000000e+00> : vector<32xf32>
    %152 = vector.multi_reduction <add>, %151, %cst_69 [1] : vector<32x32xf32> to vector<32xf32>
    %153 = vector.shape_cast %152 : vector<32xf32> to vector<32x1xf32>
    %cst_70 = arith.constant 3.200000e+01 : f32
    %154 = vector.broadcast %cst_70 : f32 to vector<32x1xf32>
    %155 = arith.divf %153, %154 : vector<32x1xf32>
    %156 = vector.broadcast %146 : vector<32x1xf32> to vector<32x32xf32>
    %157 = arith.subf %140, %156 : vector<32x32xf32>
    %cst_71 = arith.constant 9.99999974E-6 : f32
    %158 = vector.broadcast %cst_71 : f32 to vector<32x1xf32>
    %159 = arith.addf %155, %158 : vector<32x1xf32>
    %160 = math.rsqrt %159 : vector<32x1xf32>
    %161 = vector.broadcast %160 : vector<32x1xf32> to vector<32x32xf32>
    %162 = arith.mulf %157, %161 : vector<32x32xf32>
    %163 = vector.broadcast %141 : vector<1x32xf32> to vector<32x32xf32>
    %164 = arith.mulf %162, %163 : vector<32x32xf32>
    %165 = vector.broadcast %142 : vector<1x32xf32> to vector<32x32xf32>
    %166 = arith.addf %164, %165 : vector<32x32xf32>
    %c0_72 = arith.constant 0 : index
    %c0_73 = arith.constant 0 : index
    %167 = vector.load %arg23[%c0_72, %c0_73] : memref<32x1xf32, #tpu.memory_space<vmem>>, vector<32x1xf32>
    %cst_74 = arith.constant dense<0.000000e+00> : vector<32x1xf32>
    %168 = tpu.matmul %166, %167, %cst_74 {dimension_numbers = #tpu.dot_dimension_numbers<[1], [0], [0], [1], [0, 0, 1, 1], [], []>} : vector<32x32xf32>, vector<32x1xf32>, vector<32x1xf32> -> vector<32x1xf32>
    %c0_75 = arith.constant 0 : index
    %c0_76 = arith.constant 0 : index
    %169 = vector.load %arg24[%c0_75, %c0_76] : memref<1x1xf32, #tpu.memory_space<vmem>>, vector<1x1xf32>
    %170 = vector.broadcast %169 : vector<1x1xf32> to vector<32x1xf32>
    %171 = arith.addf %168, %170 : vector<32x1xf32>
    %172 = arith.negf %171 : vector<32x1xf32>
    %173 = math.exp %172 : vector<32x1xf32>
    %cst_77 = arith.constant 1.000000e+00 : f32
    %174 = vector.broadcast %cst_77 : f32 to vector<32x1xf32>
    %175 = arith.addf %174, %173 : vector<32x1xf32>
    %176 = arith.divf %174, %175 : vector<32x1xf32>
    %c0_78 = arith.constant 0 : index
    %c0_79 = arith.constant 0 : index
    %c0_80 = arith.constant 0 : index
    %177 = vector.load %arg25[%c0_78, %c0_79, %c0_80] : memref<1x32x1xf32, #tpu.memory_space<vmem>>, vector<1x32x1xf32>
    %178 = vector.shape_cast %177 : vector<1x32x1xf32> to vector<32x1xf32>
    %179 = vector.shape_cast %176 : vector<32x1xf32> to vector<1x32x1xf32>
    tpu.vector_store %arg25[%c0_78, %c0_79, %c0_80], %179 {strides = array<i32>} : memref<1x32x1xf32, #tpu.memory_space<vmem>>, vector<1x32x1xf32>,
    %c0_81 = arith.constant 0 : index
    %c0_82 = arith.constant 0 : index
    %c0_83 = arith.constant 0 : index
    %180 = vector.load %arg26[%c0_81, %c0_82, %c0_83] : memref<1x32x32xf32, #tpu.memory_space<vmem>>, vector<1x32x32xf32>
    %181 = vector.shape_cast %180 : vector<1x32x32xf32> to vector<32x32xf32>
    %182 = vector.shape_cast %99 : vector<32x32xf32> to vector<1x32x32xf32>
    tpu.vector_store %arg26[%c0_81, %c0_82, %c0_83], %182 {strides = array<i32>} : memref<1x32x32xf32, #tpu.memory_space<vmem>>, vector<1x32x32xf32>,
    return
  }
  func.func @transform_0(%arg0: i32) -> (i32, i32, i32) {
    %c0_i32 = arith.constant 0 : i32
    %c0_i32_0 = arith.constant 0 : i32
    %c0_i32_1 = arith.constant 0 : i32
    return %arg0, %c0_i32, %c0_i32_0 : i32, i32, i32
  }
  func.func @transform_1(%arg0: i32) -> (i32, i32, i32) {
    %c0_i32 = arith.constant 0 : i32
    %c0_i32_0 = arith.constant 0 : i32
    %c0_i32_1 = arith.constant 0 : i32
    return %arg0, %c0_i32, %c0_i32_0 : i32, i32, i32
  }
  func.func @transform_2(%arg0: i32) -> (i32, i32, i32) {
    %c0_i32 = arith.constant 0 : i32
    %c0_i32_0 = arith.constant 0 : i32
    %c0_i32_1 = arith.constant 0 : i32
    return %arg0, %c0_i32, %c0_i32_0 : i32, i32, i32
  }
  func.func @transform_3(%arg0: i32) -> (i32, i32) {
    %c0_i32 = arith.constant 0 : i32
    %c0_i32_0 = arith.constant 0 : i32
    %c0_i32_1 = arith.constant 0 : i32
    return %c0_i32, %c0_i32_0 : i32, i32
  }
  func.func @transform_4(%arg0: i32) -> (i32, i32) {
    %c0_i32 = arith.constant 0 : i32
    %c0_i32_0 = arith.constant 0 : i32
    %c0_i32_1 = arith.constant 0 : i32
    return %c0_i32, %c0_i32_0 : i32, i32
  }
  func.func @transform_5(%arg0: i32) -> (i32, i32) {
    %c0_i32 = arith.constant 0 : i32
    %c0_i32_0 = arith.constant 0 : i32
    %c0_i32_1 = arith.constant 0 : i32
    return %c0_i32, %c0_i32_0 : i32, i32
  }
  func.func @transform_6(%arg0: i32) -> (i32, i32) {
    %c0_i32 = arith.constant 0 : i32
    %c0_i32_0 = arith.constant 0 : i32
    %c0_i32_1 = arith.constant 0 : i32
    return %c0_i32, %c0_i32_0 : i32, i32
  }
  func.func @transform_7(%arg0: i32) -> (i32, i32) {
    %c0_i32 = arith.constant 0 : i32
    %c0_i32_0 = arith.constant 0 : i32
    %c0_i32_1 = arith.constant 0 : i32
    return %c0_i32, %c0_i32_0 : i32, i32
  }
  func.func @transform_8(%arg0: i32) -> (i32, i32) {
    %c0_i32 = arith.constant 0 : i32
    %c0_i32_0 = arith.constant 0 : i32
    %c0_i32_1 = arith.constant 0 : i32
    return %c0_i32, %c0_i32_0 : i32, i32
  }
  func.func @transform_9(%arg0: i32) -> (i32, i32) {
    %c0_i32 = arith.constant 0 : i32
    %c0_i32_0 = arith.constant 0 : i32
    %c0_i32_1 = arith.constant 0 : i32
    return %c0_i32, %c0_i32_0 : i32, i32
  }
  func.func @transform_10(%arg0: i32) -> (i32, i32) {
    %c0_i32 = arith.constant 0 : i32
    %c0_i32_0 = arith.constant 0 : i32
    %c0_i32_1 = arith.constant 0 : i32
    return %c0_i32, %c0_i32_0 : i32, i32
  }
  func.func @transform_11(%arg0: i32) -> (i32, i32) {
    %c0_i32 = arith.constant 0 : i32
    %c0_i32_0 = arith.constant 0 : i32
    %c0_i32_1 = arith.constant 0 : i32
    return %c0_i32, %c0_i32_0 : i32, i32
  }
  func.func @transform_12(%arg0: i32) -> (i32, i32) {
    %c0_i32 = arith.constant 0 : i32
    %c0_i32_0 = arith.constant 0 : i32
    %c0_i32_1 = arith.constant 0 : i32
    return %c0_i32, %c0_i32_0 : i32, i32
  }
  func.func @transform_13(%arg0: i32) -> (i32, i32) {
    %c0_i32 = arith.constant 0 : i32
    %c0_i32_0 = arith.constant 0 : i32
    %c0_i32_1 = arith.constant 0 : i32
    return %c0_i32, %c0_i32_0 : i32, i32
  }
  func.func @transform_14(%arg0: i32) -> (i32, i32) {
    %c0_i32 = arith.constant 0 : i32
    %c0_i32_0 = arith.constant 0 : i32
    %c0_i32_1 = arith.constant 0 : i32
    return %c0_i32, %c0_i32_0 : i32, i32
  }
  func.func @transform_15(%arg0: i32) -> (i32, i32) {
    %c0_i32 = arith.constant 0 : i32
    %c0_i32_0 = arith.constant 0 : i32
    %c0_i32_1 = arith.constant 0 : i32
    return %c0_i32, %c0_i32_0 : i32, i32
  }
  func.func @transform_16(%arg0: i32) -> (i32, i32) {
    %c0_i32 = arith.constant 0 : i32
    %c0_i32_0 = arith.constant 0 : i32
    %c0_i32_1 = arith.constant 0 : i32
    return %c0_i32, %c0_i32_0 : i32, i32
  }
  func.func @transform_17(%arg0: i32) -> (i32, i32) {
    %c0_i32 = arith.constant 0 : i32
    %c0_i32_0 = arith.constant 0 : i32
    %c0_i32_1 = arith.constant 0 : i32
    return %c0_i32, %c0_i32_0 : i32, i32
  }
  func.func @transform_18(%arg0: i32) -> (i32, i32) {
    %c0_i32 = arith.constant 0 : i32
    %c0_i32_0 = arith.constant 0 : i32
    %c0_i32_1 = arith.constant 0 : i32
    return %c0_i32, %c0_i32_0 : i32, i32
  }
  func.func @transform_19(%arg0: i32) -> (i32, i32) {
    %c0_i32 = arith.constant 0 : i32
    %c0_i32_0 = arith.constant 0 : i32
    %c0_i32_1 = arith.constant 0 : i32
    return %c0_i32, %c0_i32_0 : i32, i32
  }
  func.func @transform_20(%arg0: i32) -> (i32, i32) {
    %c0_i32 = arith.constant 0 : i32
    %c0_i32_0 = arith.constant 0 : i32
    %c0_i32_1 = arith.constant 0 : i32
    return %c0_i32, %c0_i32_0 : i32, i32
  }
  func.func @transform_21(%arg0: i32) -> (i32, i32) {
    %c0_i32 = arith.constant 0 : i32
    %c0_i32_0 = arith.constant 0 : i32
    %c0_i32_1 = arith.constant 0 : i32
    return %c0_i32, %c0_i32_0 : i32, i32
  }
  func.func @transform_22(%arg0: i32) -> (i32, i32) {
    %c0_i32 = arith.constant 0 : i32
    %c0_i32_0 = arith.constant 0 : i32
    %c0_i32_1 = arith.constant 0 : i32
    return %c0_i32, %c0_i32_0 : i32, i32
  }
  func.func @transform_23(%arg0: i32) -> (i32, i32) {
    %c0_i32 = arith.constant 0 : i32
    %c0_i32_0 = arith.constant 0 : i32
    %c0_i32_1 = arith.constant 0 : i32
    return %c0_i32, %c0_i32_0 : i32, i32
  }
  func.func @transform_24(%arg0: i32) -> (i32, i32, i32) {
    %c0_i32 = arith.constant 0 : i32
    %c0_i32_0 = arith.constant 0 : i32
    %c0_i32_1 = arith.constant 0 : i32
    return %arg0, %c0_i32, %c0_i32_0 : i32, i32, i32
  }
  func.func @transform_25(%arg0: i32) -> (i32, i32, i32) {
    %c0_i32 = arith.constant 0 : i32
    %c0_i32_0 = arith.constant 0 : i32
    %c0_i32_1 = arith.constant 0 : i32
    return %arg0, %c0_i32, %c0_i32_0 : i32, i32, i32
  }
}

</mosaic_0001>

<bundles_post_ra>
// kernel: sakt_forward.1
= control target key start
LH: loop header
LB: loop body
LE: loop exit
PB: predicated region body
PF: predicated region fallthrough
CT: control target
= control target key end

     0   :  { %s4549_s0 = inlined_call_operand.vmem [shape: f32[2,32,32], index: 0, kind: input, shape index: {}]   ;;  %s4550_s1 = inlined_call_operand.vmem [shape: f32[2,32,32], index: 1, kind: input, shape index: {}]   ;;  %s4551_s2 = inlined_call_operand.vmem [shape: f32[2,512,32], index: 2, kind: input, shape index: {}]   ;;  %s4552_s3 = inlined_call_operand.vmem [shape: f32[32,32], index: 3, kind: input, shape index: {}]   ;;  %s4553_s4 = inlined_call_operand.vmem [shape: f32[512,32], index: 4, kind: input, shape index: {}]   ;;  %s4554_s5 = inlined_call_operand.vmem [shape: f32[1,32], index: 5, kind: input, shape index: {}]   ;;  %s4555_s6 = inlined_call_operand.vmem [shape: f32[64,32], index: 6, kind: input, shape index: {}]   ;;  %s4556_s7 = inlined_call_operand.vmem [shape: f32[1,32], index: 7, kind: input, shape index: {}]   ;;  %s4557_s8 = inlined_call_operand.vmem [shape: f32[32,32], index: 8, kind: input, shape index: {}]   ;;  %s4558_s9 = inlined_call_operand.vmem [shape: f32[1,32], index: 9, kind: input, shape index: {}]   ;;  %s4559_s10 = inlined_call_operand.vmem [shape: f32[32,64], index: 10, kind: input, shape index: {}]   ;;  %s4560_s11 = inlined_call_operand.vmem [shape: f32[1,64], index: 11, kind: input, shape index: {}]   ;;  %s4561_s12 = inlined_call_operand.vmem [shape: f32[32,32], index: 12, kind: input, shape index: {}]   ;;  %s4562_s13 = inlined_call_operand.vmem [shape: f32[1,32], index: 13, kind: input, shape index: {}]   ;;  %s4563_s14 = inlined_call_operand.vmem [shape: f32[1,32], index: 14, kind: input, shape index: {}]   ;;  %s4564_s15 = inlined_call_operand.vmem [shape: f32[1,32], index: 15, kind: input, shape index: {}]   ;;  %s4565_s16 = inlined_call_operand.vmem [shape: f32[32,32], index: 16, kind: input, shape index: {}]   ;;  %s4566_s17 = inlined_call_operand.vmem [shape: f32[1,32], index: 17, kind: input, shape index: {}]   ;;  %s4567_s18 = inlined_call_operand.vmem [shape: f32[32,32], index: 18, kind: input, shape index: {}]   ;;  %s4568_s19 = inlined_call_operand.vmem [shape: f32[1,32], index: 19, kind: input, shape index: {}]   ;;  %s4569_s20 = inlined_call_operand.vmem [shape: f32[1,32], index: 20, kind: input, shape index: {}]   ;;  %s4570_s21 = inlined_call_operand.vmem [shape: f32[1,32], index: 21, kind: input, shape index: {}]   ;;  %s4571_s22 = inlined_call_operand.vmem [shape: f32[32,1], index: 22, kind: input, shape index: {}]   ;;  %s4572_s23 = inlined_call_operand.<no memory space> [shape: f32[1,1], index: 23, kind: input, shape index: {}]   ;;  %s4573_s24 = inlined_call_operand.vmem [shape: f32[2,32,1], index: 24, kind: output, shape index: {0}]   ;;  %s4574_s25 = inlined_call_operand.hbm [shape: f32[2,32,32], index: 25, kind: output, shape index: {1}]  }
   0x1   :  { %4590 = sst [smem:[#allocation12_spill]] %s4549_s0  ;;  %v31_v0 = vstv %s4572_s23 }
   0x2   :  { %4591 = sst [smem:[#allocation13_spill]] %s4550_s1  ;;  %32 = vst [vmem:[#allocation2] sm:$0x1] %v31_v0 }
   0x3   :  { %4592 = sst [smem:[#allocation14_spill]] %s4551_s2 }
   0x4   :  { %4593 = sst [smem:[#allocation15_spill]] %s4552_s3 }
   0x5   :  { %4594 = sst [smem:[#allocation16_spill]] %s4553_s4 }
   0x6   :  { %4595 = sst [smem:[#allocation17_spill]] %s4554_s5 }
   0x7   :  { %4596 = sst [smem:[#allocation18_spill]] %s4555_s6 }
   0x8   :  { %4597 = sst [smem:[#allocation19_spill]] %s4556_s7 }
   0x9   :  { %4598 = sst [smem:[#allocation20_spill]] %s4557_s8 }
   0xa   :  { %4599 = sst [smem:[#allocation21_spill]] %s4558_s9 }
   0xb   :  { %4600 = sst [smem:[#allocation22_spill]] %s4559_s10 }
   0xc   :  { %4601 = sst [smem:[#allocation23_spill]] %s4560_s11 }
   0xd   :  { %4602 = sst [smem:[#allocation24_spill]] %s4573_s24 }
   0xe   :  { %4603 = sst [smem:[#allocation25_spill]] %s4574_s25 }
   0xf   :  { %33 = vsyncpa [#allocation4], 0 }
  0x10   :  { %35 = vsyncpa [#allocation4 + $0x1], 0  ;;  %s3453_s6 = smov 0   ;;  %s3455_s30 = smov 0  }
  0x11   :  { %s3457_s7 = smov 0   ;;  %s3459_s3 = smov 0  }
  0x12 LB: > { %4604 = sst [smem:[#allocation6_spill]] %s3296_s6  ;;  %s3474_s23 = sadd.s32 4294967295, %s3308_s3   ;;  %s3308_s3 = sphi %s3459_s3, %s4631_s3   ;;  %s3304_s7 = sphi %s3457_s7, %s4633_s7   ;;  %s3300_s30 = sphi %s3455_s30, %s4635_s30   ;;  %s3296_s6 = sphi %s3453_s6, %s4634_s6  }
  0x13   : > { %4605 = sst [smem:[#allocation7_spill]] %s3304_s7  ;;  %s2808_s26 = sadd.s32 4294967294, %s3308_s3  }
  0x14   : > { %4606 = sst [smem:[#allocation8_spill]] %s3308_s3  ;;  %s3478_s1 = sadd.s32 1, %s3308_s3  }
  0x15   : > { %4607 = sst [smem:[#allocation9_spill]] %s3478_s1  ;;  %s593_s8 = sadd.s32 1, %s3304_s7 }
  0x16   : > { %s590_s27 = ssub.s32 %s3308_s3, %s3478_s1  ;;  %p603_p0 = scmp.ne.s32.totalorder %s3304_s7, %s3300_s30 }
  0x17   : > { %p591_p1 = scmp.eq.s32.totalorder %s590_s27, 0  ;;  %p604_p2 = scmp.eq.s32.totalorder %s3474_s23, 1 }
  0x18   : > { %p609_p3 = scmp.ne.s32.totalorder %s3300_s30, %s3296_s6  ;;  %p610_p4 = scmp.eq.s32.totalorder %s2808_s26, 1 }
  0x19   : > { %s3489_s4 = scalar_select %p591_p1, %s3304_s7, %s593_s8  }
  0x1a   : > { %p3491_p5 = por %p604_p2, %p603_p0  ;;  %p3495_p6 = por %p610_p4, %p609_p3 }
  0x1b   : > { %4608 = sst [smem:[#allocation10_spill]] %s3489_s4  ;;  %p2811_p7 = scmp.ge.s32.totalorder %s3308_s3, 1 }
  0x1c   : > { %s4610_s9 = scalar_select %p3495_p6, 1, 0 }
  0x1d   : > { %p715_p8 = scmp.lt.s32.totalorder %s3308_s3, 3 }
  0x1e   : > { %4611 = sst [smem:[#allocation11_spill]] %s4610_s9 }
  0x1f   : > { %p716_p9 = pnand %p2811_p7, %p715_p8 }
  0x20   : > { %p798_p10 = scmp.lt.s32.totalorder (!%p716_p9), %s3474_s23, 1  ;;  %s4612_s26 = sld [smem:[#allocation14_spill]] (!%p716_p9) }
  0x21   : > { %719 = sbr.rel (%p716_p9) target bundleno = 2729 (0xaa9), region = 116  ;;  %s4613_s29 = sld [smem:[#allocation16_spill]] (!%p716_p9) }
  0x22   : > { %s4614_s9 = sld [smem:[#allocation17_spill]] (!%p716_p9)  ;;  %s3310_s6 = smov (!%p716_p9), 32  }
  0x23   : > { %s4615_s27 = sld [smem:[#allocation18_spill]] (!%p716_p9)  ;;  %s3311_s7 = smov (!%p716_p9), 104  }
  0x24   : > { %s4616_s3 = sld [smem:[#allocation20_spill]] (!%p716_p9)  ;;  %s3312_s1 = smov (!%p716_p9), 120  }
  0x25   : > { %s4618_s24 = sld [smem:[#allocation12_spill]] (!%p716_p9) }
  0x26   : > { %s3503_s5 = scalar_select %p798_p10, %s3474_s23, 1  ;;  %vm1222_vm0 = vcmask 261120   ;;  %vm1239_vm1 = vcmask 523264   ;;  %vm1458_vm2 = vcmask 64512   ;;  %vm2119_vm7 = vcmask 130048  }
  0x27   : > { %s4619_s10 = sld [smem:[#allocation22_spill]]  ;;  %vm2124_vm8 = vcmask 195584  }
  0x28   : > { %s2908_s0 = sshll.u32 %s3503_s5, 9  ;;  %s3799_s4 = sshll.u32 %s3503_s5, 5 }
  0x29   : > { %s3509_s8 = scalar_lea.vmem %s4612_s26, %s2908_s0  ;;  %s4620_s2 = sld [smem:[#allocation13_spill]] }
  0x2a   : > { %v826_v1 = vld [vmem:[%s3509_s8] sm:$0xff]  ;;  %v827_v7 = vld [vmem:[%s3509_s8 + $0x8] sm:$0xff]  ;;  %v828_v13 = vld [vmem:[%s3509_s8 + $0x10] sm:$0xff]  ;;  %s4617_s0 = smov %s4616_s3  ;;  %s4624_s11 = sld [smem:[#allocation23_spill]] }
  0x2b   : > { %v858_v2 = vld [vmem:[%s3509_s8 + $0x100] sm:$0xff]  ;;  %v859_v8 = vld [vmem:[%s3509_s8 + $0x108] sm:$0xff]  ;;  %v860_v14 = vld [vmem:[%s3509_s8 + $0x110] sm:$0xff]  ;;  %s3811_s25 = scalar_lea.vmem %s4618_s24, %s3799_s4  ;;  %s3314_s5 = smov 96  }
  0x2c   : > { %v842_v3 = vld [vmem:[%s3509_s8 + $0x80] sm:$0xff]  ;;  %v2988_v4 = vpack.i.bf16 %v826_v1, %v858_v2  ;;  %v843_v9 = vld [vmem:[%s3509_s8 + $0x88] sm:$0xff]  ;;  %v2990_v11 = vpack.i.bf16 %v827_v7, %v859_v8  ;;  %v844_v15 = vld [vmem:[%s3509_s8 + $0x90] sm:$0xff]  ;;  %v2992_v17 = vpack.i.bf16 %v828_v13, %v860_v14 }
  0x2d   : > { %v874_v5 = vld [vmem:[%s3509_s8 + $0x180] sm:$0xff]  ;;  %v875_v10 = vld [vmem:[%s3509_s8 + $0x188] sm:$0xff]  ;;  %v876_v16 = vld [vmem:[%s3509_s8 + $0x190] sm:$0xff] }
  0x2e   : > { %v3040_v6 = vpack.i.bf16 %v842_v3, %v874_v5  ;;  %2989 = vxpose.xlu0.b32.start [1/16] (narrow) %v2988_v4, 32  ;;  %v3042_v12 = vpack.i.bf16 %v843_v9, %v875_v10  ;;  %v3044_v18 = vpack.i.bf16 %v844_v15, %v876_v16  ;;  %v829_v19 = vld [vmem:[%s3509_s8 + $0x18] sm:$0xff]  ;;  %v830_v25 = vld [vmem:[%s3509_s8 + $0x20] sm:$0xff]  ;;  %v831_v31 = vld [vmem:[%s3509_s8 + $0x28] sm:$0xff] }
  0x2f   : > { %v861_v20 = vld [vmem:[%s3509_s8 + $0x118] sm:$0xff]  ;;  %v862_v26 = vld [vmem:[%s3509_s8 + $0x120] sm:$0xff]  ;;  %v863_v32 = vld [vmem:[%s3509_s8 + $0x128] sm:$0xff]  ;;  %s3823_s26 = scalar_lea.vmem %s4620_s2, %s3799_s4  ;;  %s4588_s2 = smov 8  }
  0x30   : > { %3041 = vxpose.xlu1.b32.start [1/16] (narrow) %v3040_v6, 32  ;;  %v845_v21 = vld [vmem:[%s3509_s8 + $0x98] sm:$0xff]  ;;  %v2994_v23 = vpack.i.bf16 %v829_v19, %v861_v20  ;;  %v846_v27 = vld [vmem:[%s3509_s8 + $0xa0] sm:$0xff]  ;;  %v2996_v29 = vpack.i.bf16 %v830_v25, %v862_v26  ;;  %v847_v33 = vld [vmem:[%s3509_s8 + $0xa8] sm:$0xff]  ;;  %v2998_v35 = vpack.i.bf16 %v831_v31, %v863_v32 }
  0x31   : > { %v877_v22 = vld [vmem:[%s3509_s8 + $0x198] sm:$0xff]  ;;  %v878_v28 = vld [vmem:[%s3509_s8 + $0x1a0] sm:$0xff]  ;;  %v879_v34 = vld [vmem:[%s3509_s8 + $0x1a8] sm:$0xff] }
  0x32   : > { %v3046_v24 = vpack.i.bf16 %v845_v21, %v877_v22  ;;  %v3048_v30 = vpack.i.bf16 %v846_v27, %v878_v28  ;;  %v3050_v36 = vpack.i.bf16 %v847_v33, %v879_v34  ;;  %v832_v37 = vld [vmem:[%s3509_s8 + $0x30] sm:$0xff]  ;;  %v833_v43 = vld [vmem:[%s3509_s8 + $0x38] sm:$0xff]  ;;  %v834_v49 = vld [vmem:[%s3509_s8 + $0x40] sm:$0xff] }
  0x33   : > { %v864_v38 = vld [vmem:[%s3509_s8 + $0x130] sm:$0xff]  ;;  %v865_v44 = vld [vmem:[%s3509_s8 + $0x138] sm:$0xff]  ;;  %v866_v50 = vld [vmem:[%s3509_s8 + $0x140] sm:$0xff] }
  0x34   : > { %v848_v39 = vld [vmem:[%s3509_s8 + $0xb0] sm:$0xff]  ;;  %v3000_v41 = vpack.i.bf16 %v832_v37, %v864_v38  ;;  %v849_v45 = vld [vmem:[%s3509_s8 + $0xb8] sm:$0xff]  ;;  %v3002_v47 = vpack.i.bf16 %v833_v43, %v865_v44  ;;  %v850_v51 = vld [vmem:[%s3509_s8 + $0xc0] sm:$0xff]  ;;  %v3004_v53 = vpack.i.bf16 %v834_v49, %v866_v50 }
  0x35   : > { %v880_v40 = vld [vmem:[%s3509_s8 + $0x1b0] sm:$0xff]  ;;  %v881_v46 = vld [vmem:[%s3509_s8 + $0x1b8] sm:$0xff]  ;;  %v882_v52 = vld [vmem:[%s3509_s8 + $0x1c0] sm:$0xff] }
  0x36   : > { %2991 = vxpose.xlu0.b32.cont [2/16] (narrow) %v2990_v11, 32  ;;  %v3052_v42 = vpack.i.bf16 %v848_v39, %v880_v40  ;;  %v3054_v48 = vpack.i.bf16 %v849_v45, %v881_v46  ;;  %v3056_v54 = vpack.i.bf16 %v850_v51, %v882_v52  ;;  %v835_v55 = vld [vmem:[%s3509_s8 + $0x48] sm:$0xff]  ;;  %v836_v61 = vld [vmem:[%s3509_s8 + $0x50] sm:$0xff]  ;;  %v837_v3 = vld [vmem:[%s3509_s8 + $0x58] sm:$0xff] }
  0x37   : > { %v867_v56 = vld [vmem:[%s3509_s8 + $0x148] sm:$0xff]  ;;  %v868_v62 = vld [vmem:[%s3509_s8 + $0x150] sm:$0xff]  ;;  %v869_v4 = vld [vmem:[%s3509_s8 + $0x158] sm:$0xff] }
  0x38   : > { %3043 = vxpose.xlu1.b32.cont [2/16] (narrow) %v3042_v12, 32  ;;  %v851_v57 = vld [vmem:[%s3509_s8 + $0xc8] sm:$0xff]  ;;  %v3006_v59 = vpack.i.bf16 %v835_v55, %v867_v56  ;;  %v852_v63 = vld [vmem:[%s3509_s8 + $0xd0] sm:$0xff]  ;;  %v3008_v1 = vpack.i.bf16 %v836_v61, %v868_v62  ;;  %v853_v5 = vld [vmem:[%s3509_s8 + $0xd8] sm:$0xff]  ;;  %v3010_v7 = vpack.i.bf16 %v837_v3, %v869_v4 }
  0x39   : > { %v883_v58 = vld [vmem:[%s3509_s8 + $0x1c8] sm:$0xff]  ;;  %v884_v0 = vld [vmem:[%s3509_s8 + $0x1d0] sm:$0xff]  ;;  %v885_v6 = vld [vmem:[%s3509_s8 + $0x1d8] sm:$0xff] }
  0x3a   : > { %v3058_v60 = vpack.i.bf16 %v851_v57, %v883_v58  ;;  %v3060_v2 = vpack.i.bf16 %v852_v63, %v884_v0  ;;  %v3062_v8 = vpack.i.bf16 %v853_v5, %v885_v6  ;;  %v838_v9 = vld [vmem:[%s3509_s8 + $0x60] sm:$0xff]  ;;  %v909_v13 = vld [vmem:[%s4613_s29 + $0x78] sm:$0xff]  ;;  %v908_v15 = vld [vmem:[%s4613_s29 + $0x70] sm:$0xff] }
  0x3b   : > { %v870_v10 = vld [vmem:[%s3509_s8 + $0x160] sm:$0xff]  ;;  %v941_v14 = vld [vmem:[%s4613_s29 + $0x178] sm:$0xff]  ;;  %1090 = vmatpush.msra.mxu0 %v909_v13  ;;  %v907_v19 = vld [vmem:[%s4613_s29 + $0x68] sm:$0xff] }
  0x3c   : > { %v854_v11 = vld [vmem:[%s3509_s8 + $0xe0] sm:$0xff]  ;;  %1148 = vmatpush.msra.mxu2 %v941_v14  ;;  %v925_v16 = vld [vmem:[%s4613_s29 + $0xf8] sm:$0xff]  ;;  %v924_v20 = vld [vmem:[%s4613_s29 + $0xf0] sm:$0xff]  ;;  %v3012_v22 = vpack.i.bf16 %v838_v9, %v870_v10 }
  0x3d   : > { %v886_v12 = vld [vmem:[%s3509_s8 + $0x1e0] sm:$0xff]  ;;  %1119 = vmatpush.msra.mxu1 %v925_v16  ;;  %v939_v21 = vld [vmem:[%s4613_s29 + $0x168] sm:$0xff]  ;;  %1091 = vmatpush.msra.mxu0 %v908_v15  ;;  %v937_v33 = vld [vmem:[%s4613_s29 + $0x158] sm:$0xff] }
  0x3e   : > { %2993 = vxpose.xlu0.b32.cont [3/16] (narrow) %v2992_v17, 32  ;;  %v940_v17 = vld [vmem:[%s4613_s29 + $0x170] sm:$0xff]  ;;  %v3064_v25 = vpack.i.bf16 %v854_v11, %v886_v12  ;;  %v906_v26 = vld [vmem:[%s4613_s29 + $0x60] sm:$0xff]  ;;  %v955_v27 = vld [vmem:[%s4613_s29 + $0x1e8] sm:$0xff] }
  0x3f   : > { %1149 = vmatpush.msra.mxu2 %v940_v17  ;;  %1120 = vmatpush.msra.mxu1 %v924_v20  ;;  %v938_v28 = vld [vmem:[%s4613_s29 + $0x160] sm:$0xff]  ;;  %v871_v32 = vld [vmem:[%s3509_s8 + $0x168] sm:$0xff]  ;;  %v921_v37 = vld [vmem:[%s4613_s29 + $0xd8] sm:$0xff] }
  0x40   : > { %3045 = vxpose.xlu1.b32.cont [3/16] (narrow) %v3044_v18, 32  ;;  %v957_v18 = vld [vmem:[%s4613_s29 + $0x1f8] sm:$0xff]  ;;  %1092 = vmatpush.msra.mxu0 %v907_v19  ;;  %v922_v31 = vld [vmem:[%s4613_s29 + $0xe0] sm:$0xff]  ;;  %v887_v38 = vld [vmem:[%s3509_s8 + $0x1e8] sm:$0xff] }
  0x41   : > { %1177 = vmatpush.msra.mxu3 %v957_v18  ;;  %1150 = vmatpush.msra.mxu2 %v939_v21  ;;  %v954_v34 = vld [vmem:[%s4613_s29 + $0x1e0] sm:$0xff]  ;;  %v936_v39 = vld [vmem:[%s4613_s29 + $0x150] sm:$0xff]  ;;  %v953_v40 = vld [vmem:[%s4613_s29 + $0x1d8] sm:$0xff] }
  0x42   : > { %1093 = vmatpush.msra.mxu0 %v906_v26  ;;  %v935_v44 = vld [vmem:[%s4613_s29 + $0x148] sm:$0xff]  ;;  %v952_v45 = vld [vmem:[%s4613_s29 + $0x1d0] sm:$0xff]  ;;  %v934_v50 = vld [vmem:[%s4613_s29 + $0x140] sm:$0xff] }
  0x43   : > { %1151 = vmatpush.msra.mxu2 %v938_v28  ;;  %v840_v49 = vld [vmem:[%s3509_s8 + $0x70] sm:$0xff]  ;;  %v951_v51 = vld [vmem:[%s4613_s29 + $0x1c8] sm:$0xff]  ;;  %v933_v56 = vld [vmem:[%s4613_s29 + $0x138] sm:$0xff] }
  0x44   : > { %v872_v52 = vld [vmem:[%s3509_s8 + $0x170] sm:$0xff]  ;;  %v950_v57 = vld [vmem:[%s4613_s29 + $0x1c0] sm:$0xff]  ;;  %v949_v62 = vld [vmem:[%s4613_s29 + $0x1b8] sm:$0xff] }
  0x45   : > { %1152 = vmatpush.msra.mxu2 %v937_v33  ;;  %v856_v55 = vld [vmem:[%s3509_s8 + $0xf0] sm:$0xff]  ;;  %v3016_v63 = vpack.i.bf16 %v840_v49, %v872_v52  ;;  %v899_v0 = vld [vmem:[%s4613_s29 + $0x28] sm:$0xff]  ;;  %v841_v5 = vld [vmem:[%s3509_s8 + $0x78] sm:$0xff] }
  0x46   : > { %2995 = vxpose.xlu0.b32.cont [4/16] (narrow) %v2994_v23, 32  ;;  %v956_v23 = vld [vmem:[%s4613_s29 + $0x1f0] sm:$0xff]  ;;  %v931_v3 = vld [vmem:[%s4613_s29 + $0x128] sm:$0xff]  ;;  %v898_v6 = vld [vmem:[%s4613_s29 + $0x20] sm:$0xff] }
  0x47   : > { %1178 = vmatpush.msra.mxu3 %v956_v23  ;;  %1153 = vmatpush.msra.mxu2 %v936_v39  ;;  %v888_v58 = vld [vmem:[%s3509_s8 + $0x1f0] sm:$0xff]  ;;  %v930_v9 = vld [vmem:[%s4613_s29 + $0x120] sm:$0xff]  ;;  %v947_v10 = vld [vmem:[%s4613_s29 + $0x1a8] sm:$0xff] }
  0x48   : > { %3047 = vxpose.xlu1.b32.cont [4/16] (narrow) %v3046_v24, 32  ;;  %v923_v24 = vld [vmem:[%s4613_s29 + $0xe8] sm:$0xff]  ;;  %v932_v61 = vld [vmem:[%s4613_s29 + $0x130] sm:$0xff]  ;;  %v857_v11 = vld [vmem:[%s3509_s8 + $0xf8] sm:$0xff] }
  0x49   : > { %1121 = vmatpush.msra.mxu1 %v923_v24  ;;  %1179 = vmatpush.msra.mxu3 %v955_v27  ;;  %v948_v4 = vld [vmem:[%s4613_s29 + $0x1b0] sm:$0xff]  ;;  %v897_v12 = vld [vmem:[%s4613_s29 + $0x18] sm:$0xff]  ;;  %v914_v13 = vld [vmem:[%s4613_s29 + $0xa0] sm:$0xff] }
  0x4a   : > { %1154 = vmatpush.msra.mxu2 %v935_v44  ;;  %v889_v14 = vld [vmem:[%s3509_s8 + $0x1f8] sm:$0xff]  ;;  %v946_v16 = vld [vmem:[%s4613_s29 + $0x1a0] sm:$0xff]  ;;  %v896_v17 = vld [vmem:[%s4613_s29 + $0x10] sm:$0xff] }
  0x4b   : > { %1122 = vmatpush.msra.mxu1 %v922_v31  ;;  %1180 = vmatpush.msra.mxu3 %v954_v34  ;;  %v929_v15 = vld [vmem:[%s4613_s29 + $0x118] sm:$0xff]  ;;  %v928_v20 = vld [vmem:[%s4613_s29 + $0x110] sm:$0xff]  ;;  %v895_v23 = vld [vmem:[%s4613_s29 + $0x8] sm:$0xff] }
  0x4c   : > { %1155 = vmatpush.msra.mxu2 %v934_v50  ;;  %v913_v18 = vld [vmem:[%s4613_s29 + $0x98] sm:$0xff]  ;;  %v912_v24 = vld [vmem:[%s4613_s29 + $0x90] sm:$0xff]  ;;  %v894_v27 = vld [vmem:[%s4613_s29] sm:$0xff] }
  0x4d   : > { %1123 = vmatpush.msra.mxu1 %v921_v37  ;;  %1181 = vmatpush.msra.mxu3 %v953_v40  ;;  %v945_v21 = vld [vmem:[%s4613_s29 + $0x198] sm:$0xff]  ;;  %v944_v26 = vld [vmem:[%s4613_s29 + $0x190] sm:$0xff]  ;;  %v911_v28 = vld [vmem:[%s4613_s29 + $0x88] sm:$0xff] }
  0x4e   : > { %2997 = vxpose.xlu0.b32.cont [5/16] (narrow) %v2996_v29, 32  ;;  %v839_v29 = vld [vmem:[%s3509_s8 + $0x68] sm:$0xff]  ;;  %1156 = vmatpush.msra.mxu2 %v933_v56  ;;  %v910_v31 = vld [vmem:[%s4613_s29 + $0x80] sm:$0xff] }
  0x4f   : > { %v3014_v43 = vpack.i.bf16 %v839_v29, %v871_v32  ;;  %1182 = vmatpush.msra.mxu3 %v952_v45  ;;  %v926_v29 = vld [vmem:[%s4613_s29 + $0x100] sm:$0xff] }
  0x50   : > { %3049 = vxpose.xlu1.b32.cont [5/16] (narrow) %v3048_v30, 32  ;;  %v905_v30 = vld [vmem:[%s4613_s29 + $0x58] sm:$0xff]  ;;  %1157 = vmatpush.msra.mxu2 %v932_v61  ;;  %v942_v32 = vld [vmem:[%s4613_s29 + $0x180] sm:$0xff] }
  0x51   : > { %1094 = vmatpush.msra.mxu0 %v905_v30  ;;  %1183 = vmatpush.msra.mxu3 %v951_v51  ;;  %v943_v30 = vld [vmem:[%s4613_s29 + $0x188] sm:$0xff]  ;;  %v1234_v61 = vld [vmem:[%s4615_s27 + $0x38] sm:$0xff] }
  0x52   : > { %1158 = vmatpush.msra.mxu2 %v931_v3 }
  0x53   : > { %1184 = vmatpush.msra.mxu3 %v950_v57  ;;  %v3132_v57 = vld [vmem:[%s4614_s9] ss:$0 sm:$0xff]  ;;  %s3315_s9 = smov 24  }
  0x54   : > { %1159 = vmatpush.msra.mxu2 %v930_v9  ;;  %v1230_v9 = vld [vmem:[%s4615_s27 + $0x18] sm:$0xff] }
  0x55   : > { %1185 = vmatpush.msra.mxu3 %v949_v62  ;;  %v1233_v62 = vld [vmem:[%s4615_s27 + $0x30] sm:$0xff] }
  0x56   : > { %2999 = vxpose.xlu0.b32.cont [6/16] (narrow) %v2998_v35, 32  ;;  %v855_v35 = vld [vmem:[%s3509_s8 + $0xe8] sm:$0xff]  ;;  %1160 = vmatpush.msra.mxu2 %v929_v15 }
  0x57   : > { %v3066_v46 = vpack.i.bf16 %v855_v35, %v887_v38  ;;  %1186 = vmatpush.msra.mxu3 %v948_v4  ;;  %v1231_v4 = vld [vmem:[%s4615_s27 + $0x20] sm:$0xff] }
  0x58   : > { %3051 = vxpose.xlu1.b32.cont [6/16] (narrow) %v3050_v36, 32  ;;  %v904_v36 = vld [vmem:[%s4613_s29 + $0x50] sm:$0xff]  ;;  %1161 = vmatpush.msra.mxu2 %v928_v20 }
  0x59   : > { %1095 = vmatpush.msra.mxu0 %v904_v36  ;;  %1187 = vmatpush.msra.mxu3 %v947_v10 }
  0x5b   : > { %1188 = vmatpush.msra.mxu3 %v946_v16 }
  0x5d   : > { %1189 = vmatpush.msra.mxu3 %v945_v21 }
  0x5e   : > { %3001 = vxpose.xlu0.b32.cont [7/16] (narrow) %v3000_v41, 32  ;;  %v903_v41 = vld [vmem:[%s4613_s29 + $0x48] sm:$0xff] }
  0x5f   : > { %1096 = vmatpush.msra.mxu0 %v903_v41  ;;  %1190 = vmatpush.msra.mxu3 %v944_v26 }
  0x60   : > { %3053 = vxpose.xlu1.b32.cont [7/16] (narrow) %v3052_v42, 32  ;;  %v920_v42 = vld [vmem:[%s4613_s29 + $0xd0] sm:$0xff] }
  0x61   : > { %1124 = vmatpush.msra.mxu1 %v920_v42  ;;  %1191 = vmatpush.msra.mxu3 %v943_v30 }
  0x63   : > { %1192 = vmatpush.msra.mxu3 %v942_v32 }
  0x65   : > { %2911 = vmatpush.msrb.mxu3 %v1234_v61 }
  0x66   : > { %3003 = vxpose.xlu0.b32.cont [8/16] (narrow) %v3002_v47, 32  ;;  %v902_v47 = vld [vmem:[%s4613_s29 + $0x40] sm:$0xff] }
  0x67   : > { %1097 = vmatpush.msra.mxu0 %v902_v47  ;;  %2912 = vmatpush.msrb.mxu3 %v1233_v62 }
  0x68   : > { %3055 = vxpose.xlu1.b32.cont [8/16] (narrow) %v3054_v48, 32  ;;  %v919_v48 = vld [vmem:[%s4613_s29 + $0xc8] sm:$0xff] }
  0x69   : > { %1125 = vmatpush.msra.mxu1 %v919_v48 }
  0x6e   : > { %3005 = vxpose.xlu0.b32.cont [9/16] (narrow) %v3004_v53, 32  ;;  %v901_v53 = vld [vmem:[%s4613_s29 + $0x38] sm:$0xff] }
  0x6f   : > { %1098 = vmatpush.msra.mxu0 %v901_v53 }
  0x70   : > { %3057 = vxpose.xlu1.b32.cont [9/16] (narrow) %v3056_v54, 32  ;;  %v918_v54 = vld [vmem:[%s4613_s29 + $0xc0] sm:$0xff] }
  0x71   : > { %1126 = vmatpush.msra.mxu1 %v918_v54 }
  0x76   : > { %3007 = vxpose.xlu0.b32.cont [10/16] (narrow) %v3006_v59, 32  ;;  %v900_v59 = vld [vmem:[%s4613_s29 + $0x30] sm:$0xff] }
  0x77   : > { %1099 = vmatpush.msra.mxu0 %v900_v59 }
  0x78   : > { %3059 = vxpose.xlu1.b32.cont [10/16] (narrow) %v3058_v60, 32  ;;  %v917_v60 = vld [vmem:[%s4613_s29 + $0xb8] sm:$0xff] }
  0x79   : > { %1127 = vmatpush.msra.mxu1 %v917_v60  ;;  %1100 = vmatpush.msra.mxu0 %v899_v0  ;;  %v1232_v0 = vld [vmem:[%s4615_s27 + $0x28] sm:$0xff] }
  0x7a   : > { %2913 = vmatpush.msrb.mxu3 %v1232_v0 }
  0x7b   : > { %1101 = vmatpush.msra.mxu0 %v898_v6 }
  0x7c   : > { %2914 = vmatpush.msrb.mxu3 %v1231_v4 }
  0x7d   : > { %1102 = vmatpush.msra.mxu0 %v897_v12  ;;  %v1228_v12 = vld [vmem:[%s4615_s27 + $0x8] sm:$0xff] }
  0x7e   : > { %3009 = vxpose.xlu0.b32.cont [11/16] (narrow) %v3008_v1, 32  ;;  %v916_v1 = vld [vmem:[%s4613_s29 + $0xb0] sm:$0xff]  ;;  %2915 = vmatpush.msrb.mxu3 %v1230_v9 }
  0x7f   : > { %1128 = vmatpush.msra.mxu1 %v916_v1  ;;  %1103 = vmatpush.msra.mxu0 %v896_v17 }
  0x80   : > { %3061 = vxpose.xlu1.b32.cont [11/16] (narrow) %v3060_v2, 32  ;;  %v3068_v2 = vpack.i.bf16 %v856_v55, %v888_v58 }
  0x81   : > { %1104 = vmatpush.msra.mxu0 %v895_v23 }
  0x83   : > { %1105 = vmatpush.msra.mxu0 %v894_v27 }
  0x85   : > { %1260 = vmatpush.msrb.mxu0 %v1234_v61 }
  0x86   : > { %3011 = vxpose.xlu0.b32.cont [12/16] (narrow) %v3010_v7, 32  ;;  %v915_v7 = vld [vmem:[%s4613_s29 + $0xa8] sm:$0xff] }
  0x87   : > { %1129 = vmatpush.msra.mxu1 %v915_v7  ;;  %1261 = vmatpush.msrb.mxu0 %v1233_v62 }
  0x88   : > { %3063 = vxpose.xlu1.b32.cont [12/16] (narrow) %v3062_v8, 32  ;;  %v873_v8 = vld [vmem:[%s3509_s8 + $0x178] sm:$0xff]  ;;  %s4623_s8 = sld [smem:[#allocation21_spill]] }
  0x89   : > { %v3018_v19 = vpack.i.bf16 %v841_v5, %v873_v8  ;;  %1130 = vmatpush.msra.mxu1 %v914_v13  ;;  %1262 = vmatpush.msrb.mxu0 %v1232_v0  ;;  %v825_v0 = vld [vmem:[%s3823_s26 + $0x18] sm:$0xff] }
  0x8b   : > { %1131 = vmatpush.msra.mxu1 %v913_v18  ;;  %1263 = vmatpush.msrb.mxu0 %v1231_v4 }
  0x8d   : > { %1132 = vmatpush.msra.mxu1 %v912_v24  ;;  %1264 = vmatpush.msrb.mxu0 %v1230_v9 }
  0x8e   : > { %3013 = vxpose.xlu0.b32.cont [13/16] (narrow) %v3012_v22, 32  ;;  %v3070_v22 = vpack.i.bf16 %v857_v11, %v889_v14  ;;  %v1229_v11 = vld [vmem:[%s4615_s27 + $0x10] sm:$0xff] }
  0x8f   : > { %1133 = vmatpush.msra.mxu1 %v911_v28  ;;  %1265 = vmatpush.msrb.mxu0 %v1229_v11 }
  0x90   : > { %3065 = vxpose.xlu1.b32.cont [13/16] (narrow) %v3064_v25, 32  ;;  %v927_v25 = vld [vmem:[%s4613_s29 + $0x108] sm:$0xff]  ;;  %2916 = vmatpush.msrb.mxu3 %v1229_v11 }
  0x91   : > { %1162 = vmatpush.msra.mxu2 %v927_v25  ;;  %1134 = vmatpush.msra.mxu1 %v910_v31 }
  0x92   : > { %1266 = vmatpush.msrb.mxu0 %v1228_v12  ;;  %2917 = vmatpush.msrb.mxu3 %v1228_v12 }
  0x93   : > { %1163 = vmatpush.msra.mxu2 %v926_v29 }
  0x96   : > { %3015 = vxpose.xlu0.b32.cont [14/16] (narrow) %v3014_v43, 32 }
  0x98   : > { %3067 = vxpose.xlu1.b32.cont [14/16] (narrow) %v3066_v46, 32 }
  0x9e   : > { %3017 = vxpose.xlu0.b32.cont [15/16] (narrow) %v3016_v63, 32 }
  0xa0   : > { %3069 = vxpose.xlu1.b32.cont [15/16] (narrow) %v3068_v2, 32 }
  0xa6   : > { %3019 = vxpose.xlu0.b32.end [16/16] (narrow) %v3018_v19, 32 }
  0xa8   : > { %3071 = vxpose.xlu1.b32.end [16/16] (narrow) %v3070_v22, 32 }
  0xd2   : > { %v3020_v33 = vpop.trf.xlu0 }
  0xd3   : > { %v3024_v35 = vunpack.i.h.bf16 %v3020_v33  ;;  %v3021_v36 = vunpack.i.l.bf16 %v3020_v33  ;;  %v1227_v33 = vld [vmem:[%s4615_s27] sm:$0xff]  ;;  %s795_s27 = sand.u32 1, %s3300_s30  }
  0xd4   : > { %v3072_v34 = vpop.trf.xlu1  ;;  %1267 = vmatpush.msrb.mxu0 %v1227_v33  ;;  %2918 = vmatpush.msrb.mxu3 %v1227_v33 }
  0xd5   : > { %v3076_v37 = vunpack.i.h.bf16 %v3072_v34  ;;  %v3073_v38 = vunpack.i.l.bf16 %v3072_v34  ;;  %1106 = vmatmul.f32.vlgmr.msra.gmra.mxu0 %v3024_v35  ;;  %1164 = vmatmul.f32.vlgmr.msra.gmra.mxu2 %v3021_v36  ;;  %v1296_v34 = vld [vmem:[%s4616_s3 + $0x18] sm:$0xff]  ;;  %v1295_v35 = vld [vmem:[%s4617_s0 + $0x10] sm:$0xff]  ;;  %s4621_s3 = sld [smem:[#allocation19_spill]] }
  0xd6   : > { %1325 = vmatpush.msrb.mxu1 %v1296_v34  ;;  %v1345_v36 = vld [vmem:[%s4619_s10 + $0x18] sm:$0xff] }
  0xd7   : > { %1135 = vmatmul.f32.vlgmr.msra.gmra.mxu1 %v3076_v37  ;;  %1193 = vmatmul.f32.vlgmr.msra.gmra.mxu3 %v3073_v38  ;;  %v1294_v37 = vld [vmem:[%s4617_s0 + $0x8] sm:$0xff]  ;;  %v1344_v38 = vld [vmem:[%s4619_s10 + $0x10] sm:$0xff] }
  0xd8   : > { %1374 = vmatpush.msrb.mxu2 %v1345_v36  ;;  %1326 = vmatpush.msrb.mxu1 %v1295_v35 }
  0xda   : > { %v3025_v39 = vpop.trf.xlu0  ;;  %1375 = vmatpush.msrb.mxu2 %v1344_v38  ;;  %1327 = vmatpush.msrb.mxu1 %v1294_v37 }
  0xdb   : > { %v3026_v41 = vunpack.i.l.bf16 %v3025_v39  ;;  %v3029_v42 = vunpack.i.h.bf16 %v3025_v39  ;;  %v1343_v39 = vld [vmem:[%s4619_s10 + $0x8] sm:$0xff] }
  0xdc   : > { %v3077_v40 = vpop.trf.xlu1  ;;  %1376 = vmatpush.msrb.mxu2 %v1343_v39 }
  0xdd   : > { %v3078_v43 = vunpack.i.l.bf16 %v3077_v40  ;;  %v3081_v44 = vunpack.i.h.bf16 %v3077_v40  ;;  %1167 = vmatmul.f32.gmra.mxu2 %v3026_v41  ;;  %1109 = vmatmul.f32.gmra.mxu0 %v3029_v42  ;;  %v818_v40 = vld [vmem:[%s3811_s25] sm:$0xff] }
  0xde   : > { %v1293_v41 = vld [vmem:[%s4617_s0] sm:$0xff] }
  0xdf   : > { %1196 = vmatmul.f32.gmra.mxu3 %v3078_v43  ;;  %1138 = vmatmul.f32.gmra.mxu1 %v3081_v44  ;;  %v822_v42 = vld [vmem:[%s3823_s26] sm:$0xff] }
  0xe0   : > { %1328 = vmatpush.msrb.mxu1 %v1293_v41 }
  0xe2   : > { %v3030_v45 = vpop.trf.xlu0 }
  0xe3   : > { %v3031_v47 = vunpack.i.l.bf16 %v3030_v45  ;;  %v3034_v48 = vunpack.i.h.bf16 %v3030_v45  ;;  %v819_v45 = vld [vmem:[%s3811_s25 + $0x8] sm:$0xff] }
  0xe4   : > { %v3082_v46 = vpop.trf.xlu1 }
  0xe5   : > { %v3083_v49 = vunpack.i.l.bf16 %v3082_v46  ;;  %v3086_v50 = vunpack.i.h.bf16 %v3082_v46  ;;  %1170 = vmatmul.f32.gmra.mxu2 %v3031_v47  ;;  %1112 = vmatmul.f32.gmra.mxu0 %v3034_v48  ;;  %v823_v46 = vld [vmem:[%s3823_s26 + $0x8] sm:$0xff] }
  0xe7   : > { %1199 = vmatmul.f32.gmra.mxu3 %v3083_v49  ;;  %1141 = vmatmul.f32.gmra.mxu1 %v3086_v50  ;;  %v820_v49 = vld [vmem:[%s3811_s25 + $0x10] sm:$0xff] }
  0xea   : > { %v3035_v51 = vpop.trf.xlu0 }
  0xeb   : > { %v3036_v53 = vunpack.i.l.bf16 %v3035_v51  ;;  %v3039_v54 = vunpack.i.h.bf16 %v3035_v51 }
  0xec   : > { %v3087_v52 = vpop.trf.xlu1 }
  0xed   : > { %v3088_v55 = vunpack.i.l.bf16 %v3087_v52  ;;  %v3091_v56 = vunpack.i.h.bf16 %v3087_v52  ;;  %1173 = vmatmul.f32.gmra.mxu2 %v3036_v53  ;;  %1115 = vmatmul.f32.gmra.mxu0 %v3039_v54  ;;  %v821_v52 = vld [vmem:[%s3811_s25 + $0x18] sm:$0xff]  ;;  %s4622_s25 = sld [smem:[#allocation15_spill]] }
  0xef   : > { %1202 = vmatmul.f32.gmra.mxu3 %v3088_v55  ;;  %1144 = vmatmul.f32.gmra.mxu1 %v3091_v56  ;;  %v824_v55 = vld [vmem:[%s3823_s26 + $0x10] sm:$0xff]  ;;  %v1342_v56 = vld [vmem:[%s4619_s10] sm:$0xff] }
  0xf0   : > { %1377 = vmatpush.msrb.mxu2 %v1342_v56 }
  0xf3   : > { %v892_v12 = vld [vmem:[%s4622_s25 + $0x10] sm:$0xff] }
  0xf7   : > { %2825 = vmatmul.msk.f32.vlgmr.msrb.gmra.mxu1 %vm1222_vm0, %v822_v42 }
  0xff   : > { %2826 = vmatmul.msk.f32.gmra.mxu1 %vm1222_vm0, %v823_v46 }
 0x107   : > { %2827 = vmatmul.msk.f32.gmra.mxu1 %vm1222_vm0, %v824_v55 }
 0x10f   : > { %2828 = vmatmul.msk.f32.gmra.mxu1 %vm1222_vm0, %v825_v0 }
 0x152   : > { %v1107_v58 = vpop.f32.mrf.mxu0 }
 0x153   : > { %v1108_v59 = vadd.f32 %v3132_v57, %v1107_v58  ;;  %v890_v58 = vld [vmem:[%s4622_s25] sm:$0xff] }
 0x154   : > { %v1136_v60 = vpop.f32.mrf.mxu1  ;;  %v1285_v61 = vadd.f32 %v890_v58, %v818_v40 }
 0x155   : > { %v1137_v63 = vadd.f32 %v1136_v60, %v1108_v59 }
 0x158   : > { %v1165_v1 = vpop.f32.mrf.mxu2 }
 0x159   : > { %v1166_v2 = vadd.f32 %v1165_v1, %v1137_v63  ;;  %v3134_v1 = vld [vmem:[%s4623_s8] ss:$0 sm:$0xff]  ;;  %s3313_s8 = smov 112  }
 0x15a   : > { %v1194_v3 = vpop.f32.mrf.mxu3  ;;  %v1110_v5 = vpop.f32.mrf.mxu0 }
 0x15b   : > { %v1195_v6 = vadd.f32 %v1194_v3, %v1166_v2  ;;  %v1111_v7 = vadd.f32 %v3132_v57, %v1110_v5  ;;  %v891_v3 = vld [vmem:[%s4622_s25 + $0x8] sm:$0xff] }
 0x15c   : > { %v1139_v8 = vpop.f32.mrf.mxu1 }
 0x15d   : > { %1210 = vrot.lane.b32.xlu2 %v1195_v6, %s3310_s6  ;;  %v1140_v10 = vadd.f32 %v1139_v8, %v1111_v7  ;;  %v1286_v7 = vadd.f32 %v891_v3, %v819_v45 }
 0x160   : > { %v1168_v13 = vpop.f32.mrf.mxu2 }
 0x161   : > { %v1169_v14 = vadd.f32 %v1168_v13, %v1140_v10 }
 0x162   : > { %v1197_v15 = vpop.f32.mrf.mxu3  ;;  %v1113_v16 = vpop.f32.mrf.mxu0 }
 0x163   : > { %v1198_v17 = vadd.f32 %v1197_v15, %v1169_v14  ;;  %v1114_v18 = vadd.f32 %v3132_v57, %v1113_v16  ;;  %v1287_v15 = vadd.f32 %v892_v12, %v820_v49 }
 0x164   : > { %v1142_v19 = vpop.f32.mrf.mxu1 }
 0x165   : > { %1212 = vrot.lane.b32.xlu2 %v1198_v17, %s3310_s6  ;;  %v1143_v20 = vadd.f32 %v1142_v19, %v1114_v18  ;;  %v893_v18 = vld [vmem:[%s4622_s25 + $0x18] sm:$0xff] }
 0x168   : > { %v1171_v21 = vpop.f32.mrf.mxu2 }
 0x169   : > { %v1172_v22 = vadd.f32 %v1171_v21, %v1143_v20  ;;  %v1288_v21 = vadd.f32 %v893_v18, %v821_v52 }
 0x16a   : > { %v1200_v23 = vpop.f32.mrf.mxu3  ;;  %v1116_v24 = vpop.f32.mrf.mxu0 }
 0x16b   : > { %v1201_v25 = vadd.f32 %v1200_v23, %v1172_v22  ;;  %v1117_v26 = vadd.f32 %v3132_v57, %v1116_v24  ;;  %v3133_v57 = vld [vmem:[%s4621_s3] ss:$0 sm:$0xff]  ;;  %s3316_s3 = smov 16  }
 0x16c   : > { %v1145_v27 = vpop.f32.mrf.mxu1 }
 0x16d   : > { %1214 = vrot.lane.b32.xlu2 %v1201_v25, %s3310_s6  ;;  %v1146_v28 = vadd.f32 %v1145_v27, %v1117_v26  ;;  %v3135_v26 = vld [vmem:[%s4624_s11] ss:$0 sm:$0xff] }
 0x170   : > { %v1174_v29 = vpop.f32.mrf.mxu2 }
 0x171   : > { %v1175_v30 = vadd.f32 %v1174_v29, %v1146_v28 }
 0x172   : > { %v1203_v31 = vpop.f32.mrf.mxu3 }
 0x173   : > { %v1204_v32 = vadd.f32 %v1203_v31, %v1175_v30 }
 0x174   : > { %v1330_v2 = vpop.f32.mrf.mxu1 }
 0x175   : > { %1216 = vrot.lane.b32.xlu2 %v1204_v32, %s3310_s6  ;;  %v3873_v4 = vadd.f32 %v3134_v1, %v1330_v2  ;;  %s2679_s6 = scalar_lea.sflag [#allocation4], %s795_s27 }
 0x177   : > { %1411 = vrot.lane.b32.xlu0 %v3873_v4, %s3311_s7 }
 0x17c   : > { %v1333_v10 = vpop.f32.mrf.mxu1 }
 0x17d   : > { %1395 = vrot.lane.b32.xlu2 %v3873_v4, %s3312_s1  ;;  %v3881_v11 = vadd.f32 %v3134_v1, %v1333_v10 }
 0x184   : > { %v1336_v24 = vpop.f32.mrf.mxu1 }
 0x185   : > { %1397 = vrot.lane.b32.xlu2 %v3881_v11, %s3312_s1  ;;  %v1337_v25 = vadd.f32 %v3134_v1, %v1336_v24 }
 0x18c   : > { %v1339_v35 = vpop.f32.mrf.mxu1 }
 0x18d   : > { %1399 = vrot.lane.b32.xlu2 %v1337_v25, %s3312_s1  ;;  %v1340_v36 = vadd.f32 %v3134_v1, %v1339_v35 }
 0x1b7   : > { %v1211_v43 = vpop.permute.xlu2 %1210 }
 0x1b8   : > { %v1223_v44 = vsel %vm1222_vm0, %v818_v40, %v1211_v43 }
 0x1b9   : > { %2821 = vmatmul.msk.f32.vlgmr.msrb.gmra.mxu0 %vm1239_vm1, %v1223_v44 }
 0x1bf   : > { %v1213_v47 = vpop.permute.xlu2 %1212 }
 0x1c0   : > { %v1224_v48 = vsel %vm1222_vm0, %v819_v45, %v1213_v47 }
 0x1c1   : > { %2822 = vmatmul.msk.f32.gmra.mxu0 %vm1239_vm1, %v1224_v48 }
 0x1c7   : > { %v1215_v50 = vpop.permute.xlu2 %1214 }
 0x1c8   : > { %v1225_v51 = vsel %vm1222_vm0, %v820_v49, %v1215_v50 }
 0x1c9   : > { %2823 = vmatmul.msk.f32.vlgmr.msrb.gmra.mxu3 %vm1239_vm1, %v1225_v51 }
 0x1cf   : > { %v1217_v53 = vpop.permute.xlu2 %1216 }
 0x1d0   : > { %v1226_v54 = vsel %vm1222_vm0, %v821_v52, %v1217_v53  ;;  %v1447_v52 = vlaneseq }
 0x1d1   : > { %2824 = vmatmul.msk.f32.gmra.mxu3 %vm1239_vm1, %v1226_v54 }
 0x1d2   : > { %v3979_v54 = vshrl.u32 %v1447_v52, 7  ;;  %v3981_v55 = vand.u32 127, %v1447_v52 }
 0x1d4   : > { %vm1454_vm3 = vcmp.gt.s32.totalorder %v3981_v55, %v3979_v54  ;;  %v4004_v1 = vadd.s32 16, %v3979_v54  ;;  %v4024_v10 = vadd.s32 24, %v3979_v54 }
 0x1d6   : > { %vm1456_vm4 = vcmp.gt.s32.totalorder %v3981_v55, %v4004_v1  ;;  %vm1457_vm5 = vcmp.gt.s32.totalorder %v3981_v55, %v4024_v10 }
 0x1d7   : > { %v1396_v37 = vpop.permute.xlu2 %1395 }
 0x1df   : > { %v1398_v38 = vpop.permute.xlu2 %1397 }
 0x1e7   : > { %v1400_v39 = vpop.permute.xlu2 %1399 }
 0x1e9   : > { %v1412_v3 = vpop.permute.xlu0 %1411 }
 0x236   : > { %v1269_v59 = vpop.f32.mrf.mxu0 }
 0x237   : > { %v1270_v60 = vadd.f32 %v3133_v57, %v1269_v59 }
 0x239   : > { %v1281_v62 = vmax.f32 %v1270_v60, 0.0 }
 0x23b   : > { %v3861_v63 = vadd.f32 %v1285_v61, %v1281_v62 }
 0x23d   : > { %2829 = vmatmul.msk.f32.vlgmr.msrb.gmra.mxu2 %vm1222_vm0, %v3861_v63 }
 0x23e   : > { %v1272_v5 = vpop.f32.mrf.mxu0 }
 0x23f   : > { %v1273_v6 = vadd.f32 %v3133_v57, %v1272_v5 }
 0x241   : > { %v1282_v8 = vmax.f32 %v1273_v6, 0.0 }
 0x243   : > { %v3879_v9 = vadd.f32 %v1286_v7, %v1282_v8 }
 0x245   : > { %2830 = vmatmul.msk.f32.gmra.mxu2 %vm1222_vm0, %v3879_v9 }
 0x24c   : > { %v1275_v13 = vpop.f32.mrf.mxu3 }
 0x24d   : > { %v1276_v14 = vadd.f32 %v3133_v57, %v1275_v13 }
 0x24f   : > { %v1283_v16 = vmax.f32 %v1276_v14, 0.0 }
 0x251   : > { %v3890_v17 = vadd.f32 %v1287_v15, %v1283_v16 }
 0x253   : > { %2831 = vmatmul.msk.f32.gmra.mxu2 %vm1222_vm0, %v3890_v17 }
 0x254   : > { %v1278_v19 = vpop.f32.mrf.mxu3 }
 0x255   : > { %v1279_v20 = vadd.f32 %v3133_v57, %v1278_v19 }
 0x257   : > { %v1284_v22 = vmax.f32 %v1279_v20, 0.0 }
 0x259   : > { %v3897_v23 = vadd.f32 %v1288_v21, %v1284_v22  ;;  %v4058_v21 = vadd.s32 8, %v3979_v54 }
 0x25b   : > { %2832 = vmatmul.msk.f32.gmra.mxu2 %vm1222_vm0, %v3897_v23  ;;  %vm1455_vm6 = vcmp.gt.s32.totalorder %v3981_v55, %v4058_v21 }
 0x2c0   : > { %v1379_v27 = vpop.f32.mrf.mxu2 }
 0x2c1   : > { %v3905_v28 = vadd.f32 %v3135_v26, %v1379_v27 }
 0x2c3   : > { %1423 = vrot.lane.b32.xlu2 %v3905_v28, %s3312_s1 }
 0x2c8   : > { %v1382_v29 = vpop.f32.mrf.mxu2 }
 0x2c9   : > { %v3911_v30 = vadd.f32 %v3135_v26, %v1382_v29 }
 0x2cb   : > { %1439 = vrot.lane.b32.xlu2 %v3905_v28, %s3311_s7 }
 0x2d3   : > { %1425 = vrot.lane.b32.xlu2 %v3911_v30, %s3312_s1 }
 0x2d6   : > { %v1385_v31 = vpop.f32.mrf.mxu2 }
 0x2d7   : > { %v3915_v32 = vadd.f32 %v3135_v26, %v1385_v31 }
 0x2d9   : > { %1435 = vrot.lane.b32.xlu1 %v3915_v32, %s3313_s8 }
 0x2db   : > { %1441 = vrot.lane.b32.xlu2 %v3911_v30, %s3311_s7 }
 0x2de   : > { %v1388_v33 = vpop.f32.mrf.mxu2 }
 0x2df   : > { %v3921_v34 = vadd.f32 %v3135_v26, %v1388_v33 }
 0x2e1   : > { %2833 = vmatpush.xpose.msk.msra.mxu3 %vm1458_vm2, %v3921_v34 }
 0x2e3   : > { %1427 = vrot.lane.b32.xlu2 %v3915_v32, %s3312_s1 }
 0x2e5   : > { %2834 = vmatpush.xpose.msk.msra.mxu3 %vm1458_vm2, %v3915_v32 }
 0x2e9   : > { %2835 = vmatpush.xpose.msk.msra.mxu3 %vm1458_vm2, %v3911_v30 }
 0x2eb   : > { %1443 = vrot.lane.b32.xlu2 %v3915_v32, %s3311_s7 }
 0x2ed   : > { %2836 = vmatpush.xpose.msk.msra.mxu3 %vm1458_vm2, %v3905_v28 }
 0x2f0   : > { %2837 = vmatmul.msk.f32.vlgmr.msra.gmra.mxu3 %vm1458_vm2, %v3873_v4 }
 0x2f3   : > { %1401 = vrot.lane.b32.xlu2 %v1340_v36, %s3312_s1 }
 0x2f8   : > { %2838 = vmatmul.msk.f32.gmra.mxu3 %vm1458_vm2, %v3881_v11 }
 0x2fb   : > { %1433 = vrot.lane.b32.xlu2 %v3911_v30, %s3313_s8 }
 0x300   : > { %2839 = vmatmul.msk.f32.gmra.mxu3 %vm1458_vm2, %v1337_v25 }
 0x303   : > { %1413 = vrot.lane.b32.xlu2 %v3881_v11, %s3311_s7 }
 0x308   : > { %2840 = vmatmul.msk.f32.gmra.mxu3 %vm1458_vm2, %v1340_v36 }
 0x30b   : > { %1429 = vrot.lane.b32.xlu2 %v3921_v34, %s3312_s1 }
 0x313   : > { %1431 = vrot.lane.b32.xlu2 %v3905_v28, %s3313_s8 }
 0x31b   : > { %1445 = vrot.lane.b32.xlu2 %v3921_v34, %s3311_s7 }
 0x31d   : > { %v3952_v40 = vpop.permute.xlu2 %1423 }
 0x323   : > { %1403 = vrot.lane.b32.xlu2 %v3873_v4, %s3313_s8 }
 0x325   : > { %v3956_v41 = vpop.permute.xlu2 %1439 }
 0x32b   : > { %1437 = vrot.lane.b32.xlu2 %v3921_v34, %s3313_s8 }
 0x32d   : > { %v3960_v42 = vpop.permute.xlu2 %1425 }
 0x333   : > { %1415 = vrot.lane.b32.xlu2 %v1337_v25, %s3311_s7 }
 0x335   : > { %v1442_v43 = vpop.permute.xlu2 %1441 }
 0x33b   : > { %1405 = vrot.lane.b32.xlu2 %v3881_v11, %s3313_s8 }
 0x33d   : > { %v1428_v44 = vpop.permute.xlu2 %1427 }
 0x343   : > { %1417 = vrot.lane.b32.xlu2 %v1340_v36, %s3311_s7  ;;  %s2812_s7 = sshll.u32 %s795_s27, 5 }
 0x344   : > { %s4270_s1 = scalar_lea.vmem [#allocation3], %s2812_s7  ;;  %s2910_s7 = sshll.u32 %s3474_s23, 5 }
 0x345   : > { %v1444_v45 = vpop.permute.xlu2 %1443  ;;  %s2694_s29 = sshll.u32 %s4270_s1, 4  ;;  %s2695_s29 = int_to_ptr.vmem [resolvable:$true] %s2694_s29 }
 0x34b   : > { %1407 = vrot.lane.b32.xlu2 %v1337_v25, %s3313_s8  ;;  %v4027_v11 = vpop.permute.xlu1 %1435 }
 0x34d   : > { %v1402_v46 = vpop.permute.xlu2 %1401 }
 0x353   : > { %1409 = vrot.lane.b32.xlu2 %v1340_v36, %s3313_s8 }
 0x355   : > { %v3968_v47 = vpop.permute.xlu2 %1433 }
 0x356   : > { %v3112_v48 = vpack.i.bf16 %v3968_v47, %v3960_v42 }
 0x35d   : > { %v1414_v49 = vpop.permute.xlu2 %1413 }
 0x365   : > { %v1430_v50 = vpop.permute.xlu2 %1429 }
 0x366   : > { %v3097_v51 = vpack.i.bf16 %v1442_v43, %v1430_v50  ;;  %2841 = vmatpush.xpose.msk.msra.mxu0 %vm1458_vm2, %v1430_v50 }
 0x368   : > { %3098 = vrot.lane.b32.xlu2 %v3097_v51, %s3314_s5 }
 0x36a   : > { %2842 = vmatpush.xpose.msk.msra.mxu0 %vm1458_vm2, %v1428_v44 }
 0x36d   : > { %v3975_v53 = vpop.permute.xlu2 %1431 }
 0x36e   : > { %2843 = vmatpush.xpose.msk.msra.mxu0 %vm1458_vm2, %v3960_v42 }
 0x372   : > { %2844 = vmatpush.xpose.msk.msra.mxu0 %vm1458_vm2, %v3952_v40 }
 0x373   : > { %v1492_v56 = vpop.f32.mrf.mxu3 }
 0x374   : > { %v1639_v57 = vmul.f32 0.35355338, %v1492_v56 }
 0x375   : > { %2845 = vmatmul.msk.f32.vlgmr.msra.gmra.mxu0 %vm1458_vm2, %v1396_v37  ;;  %v1446_v58 = vpop.permute.xlu2 %1445 }
 0x376   : > { %v3092_v59 = vpack.i.bf16 %v1444_v45, %v1446_v58  ;;  %2857 = vmatpush.xpose.msk.msra.mxu2 %vm1458_vm2, %v1446_v58  ;;  %2923 = vmatpush.xpose.msk.msrb.mxu3 %vm1458_vm2, %v1446_v58  ;;  %v3993_v60 = vsel %vm1454_vm3, -1e+30, %v1639_v57 }
 0x377   : > { %v1679_v61 = vsel %vm1222_vm0, %v3993_v60, -inf }
 0x378   : > { %3093 = vrot.lane.b32.xlu0 %v3092_v59, %s3314_s5  ;;  %1680 = vmax.xlane.f32.xlu1 %v1679_v61 }
 0x37a   : > { %2858 = vmatpush.xpose.msk.msra.mxu2 %vm1458_vm2, %v1444_v45  ;;  %2924 = vmatpush.xpose.msk.msrb.mxu3 %vm1458_vm2, %v1444_v45 }
 0x37b   : > { %v1495_v62 = vpop.f32.mrf.mxu3 }
 0x37c   : > { %v1640_v22 = vmul.f32 0.35355338, %v1495_v62 }
 0x37d   : > { %2846 = vmatmul.msk.f32.gmra.mxu0 %vm1458_vm2, %v1398_v38  ;;  %v1404_v0 = vpop.permute.xlu2 %1403 }
 0x37e   : > { %2859 = vmatpush.xpose.msk.msra.mxu2 %vm1458_vm2, %v1442_v43  ;;  %2925 = vmatpush.xpose.msk.msrb.mxu3 %vm1458_vm2, %v1442_v43  ;;  %v4066_v25 = vsel %vm1455_vm6, -1e+30, %v1640_v22 }
 0x37f   : > { %v1682_v26 = vsel %vm1222_vm0, %v4066_v25, -inf }
 0x382   : > { %2860 = vmatpush.xpose.msk.msra.mxu2 %vm1458_vm2, %v3956_v41  ;;  %2926 = vmatpush.xpose.msk.msrb.mxu3 %vm1458_vm2, %v3956_v41 }
 0x383   : > { %v1498_v2 = vpop.f32.mrf.mxu3 }
 0x384   : > { %v1641_v4 = vmul.f32 0.35355338, %v1498_v2 }
 0x385   : > { %2847 = vmatmul.msk.f32.gmra.mxu0 %vm1458_vm2, %v1400_v39  ;;  %2861 = vmatmul.msk.f32.vlgmr.msra.gmra.mxu2 %vm1458_vm2, %v1412_v3  ;;  %v1438_v5 = vpop.permute.xlu2 %1437 }
 0x386   : > { %v3102_v6 = vpack.i.bf16 %v1428_v44, %v1438_v5  ;;  %2849 = vmatpush.xpose.msk.msrb.mxu0 %vm1458_vm2, %v1438_v5  ;;  %2919 = vmatpush.xpose.msk.msra.mxu1 %vm1458_vm2, %v1438_v5  ;;  %v4019_v7 = vsel %vm1456_vm4, -1e+30, %v1641_v4 }
 0x387   : > { %v1685_v8 = vsel %vm1222_vm0, %v4019_v7, -inf }
 0x388   : > { %3103 = vrot.lane.b32.xlu0 %v3102_v6, %s3314_s5  ;;  %1686 = vmax.xlane.f32.xlu1 %v1685_v8 }
 0x38a   : > { %2850 = vmatpush.xpose.msk.msrb.mxu0 %vm1458_vm2, %v4027_v11  ;;  %2920 = vmatpush.xpose.msk.msra.mxu1 %vm1458_vm2, %v4027_v11 }
 0x38b   : > { %v1501_v12 = vpop.f32.mrf.mxu3 }
 0x38c   : > { %v1642_v13 = vmul.f32 0.35355338, %v1501_v12 }
 0x38d   : > { %2848 = vmatmul.msk.f32.gmra.mxu0 %vm1458_vm2, %v1402_v46  ;;  %2862 = vmatmul.msk.f32.gmra.mxu2 %vm1458_vm2, %v1414_v49  ;;  %v1416_v14 = vpop.permute.xlu2 %1415 }
 0x38e   : > { %2851 = vmatpush.xpose.msk.msrb.mxu0 %vm1458_vm2, %v3968_v47  ;;  %2921 = vmatpush.xpose.msk.msra.mxu1 %vm1458_vm2, %v3968_v47  ;;  %v4044_v15 = vsel %vm1457_vm5, -1e+30, %v1642_v13 }
 0x38f   : > { %v1688_v16 = vsel %vm1222_vm0, %v4044_v15, -inf }
 0x390   : > { %1689 = vmax.xlane.f32.xlu1 %v1688_v16 }
 0x392   : > { %2852 = vmatpush.xpose.msk.msrb.mxu0 %vm1458_vm2, %v3975_v53  ;;  %2922 = vmatpush.xpose.msk.msra.mxu1 %vm1458_vm2, %v3975_v53 }
 0x395   : > { %2853 = vmatmul.msk.f32.vlgmr.msrb.gmra.mxu0 %vm1458_vm2, %v1404_v0  ;;  %2863 = vmatmul.msk.f32.gmra.mxu2 %vm1458_vm2, %v1416_v14  ;;  %v1406_v18 = vpop.permute.xlu2 %1405 }
 0x396   : > { %2854 = vmatmul.msk.f32.vlgmr.msra.gmra.mxu1 %vm1458_vm2, %v1406_v18 }
 0x39d   : > { %v1418_v19 = vpop.permute.xlu2 %1417 }
 0x39e   : > { %2864 = vmatmul.msk.f32.vlgmr.msrb.gmra.mxu3 %vm1458_vm2, %v1418_v19 }
 0x3a5   : > { %v1408_v20 = vpop.permute.xlu2 %1407 }
 0x3a6   : > { %2855 = vmatmul.msk.f32.gmra.mxu1 %vm1458_vm2, %v1408_v20 }
 0x3ad   : > { %v1410_v24 = vpop.permute.xlu2 %1409 }
 0x3ae   : > { %2856 = vmatmul.msk.f32.gmra.mxu1 %vm1458_vm2, %v1410_v24 }
 0x3b2   : > { %1683 = vmax.xlane.f32.xlu0 %v1682_v26 }
 0x3c2   : > { %v3099_v27 = vpop.permute.xlu2 %3098 }
 0x3c3   : > { %v3100_v29 = vunpack.i.l.bf16 %v3099_v27  ;;  %v3101_v36 = vunpack.i.h.bf16 %v3099_v27 }
 0x3c5   : > { %1944 = vmatpush.msra.mxu0 %v3100_v29 }
 0x3ea   : > { %v3094_v31 = vpop.permute.xlu0 %3093 }
 0x3eb   : > { %v3095_v33 = vunpack.i.l.bf16 %v3094_v31  ;;  %v3096_v35 = vunpack.i.h.bf16 %v3094_v31  ;;  %v1681_v10 = vpop.xlane.xlu1 %1680 }
 0x3ed   : > { %2050 = vmatpush.msrb.mxu2 %v3095_v33 }
 0x3ef   : > { %2051 = vmatpush.msrb.mxu2 %v3096_v35  ;;  %v3107_v35 = vpack.i.bf16 %v4027_v11, %v3956_v41 }
 0x3f1   : > { %2052 = vmatpush.msrb.mxu2 %v3101_v36 }
 0x3f2   : > { %v1537_v37 = vpop.f32.mrf.mxu0 }
 0x3f3   : > { %v1643_v38 = vmul.f32 0.35355338, %v1537_v37 }
 0x3f5   : > { %v4073_v39 = vsel %vm1454_vm3, -1e+30, %v1643_v38 }
 0x3f6   : > { %v1691_v43 = vsel %vm1222_vm0, %v4073_v39, -inf }
 0x3f7   : > { %1692 = vmax.xlane.f32.xlu1 %v1691_v43 }
 0x3fa   : > { %v1540_v44 = vpop.f32.mrf.mxu0  ;;  %v3104_v45 = vpop.permute.xlu0 %3103 }
 0x3fb   : > { %v3106_v46 = vunpack.i.h.bf16 %v3104_v45  ;;  %v3105_v49 = vunpack.i.l.bf16 %v3104_v45  ;;  %v1644_v61 = vmul.f32 0.35355338, %v1540_v44 }
 0x3fd   : > { %1945 = vmatpush.msra.mxu0 %v3106_v46  ;;  %1997 = vmatpush.msrb.mxu1 %v3105_v49  ;;  %v4094_v2 = vsel %vm1455_vm6, -1e+30, %v1644_v61 }
 0x3fe   : > { %v1694_v8 = vsel %vm1222_vm0, %v4094_v2, -inf }
 0x402   : > { %v1543_v50 = vpop.f32.mrf.mxu0 }
 0x403   : > { %v1645_v27 = vmul.f32 0.35355338, %v1543_v50 }
 0x405   : > { %v4125_v36 = vsel %vm1456_vm4, -1e+30, %v1645_v27 }
 0x406   : > { %v1697_v43 = vsel %vm1222_vm0, %v4125_v36, -inf }
 0x408   : > { %v1627_v51 = vpop.f32.mrf.mxu2 }
 0x409   : > { %v1651_v52 = vmul.f32 0.35355338, %v1627_v51  ;;  %v4155_v51 = vpop.xlane.xlu1 %1686 }
 0x40a   : > { %v1546_v56 = vpop.f32.mrf.mxu0 }
 0x40b   : > { %v1646_v57 = vmul.f32 0.35355338, %v1546_v56  ;;  %v4080_v58 = vsel %vm1454_vm3, -1e+30, %v1651_v52 }
 0x40c   : > { %v1715_v59 = vsel %vm1222_vm0, %v4080_v58, -inf }
 0x40d   : > { %1716 = vmax.xlane.f32.xlu2 %v1715_v59  ;;  %v4087_v62 = vsel %vm1457_vm5, -1e+30, %v1646_v57 }
 0x40e   : > { %v1700_v0 = vsel %vm1222_vm0, %v4087_v62, -inf }
 0x40f   : > { %1701 = vmax.xlane.f32.xlu0 %v1700_v0 }
 0x410   : > { %v1630_v24 = vpop.f32.mrf.mxu2 }
 0x411   : > { %v1652_v33 = vmul.f32 0.35355338, %v1630_v24  ;;  %v4157_v52 = vpop.xlane.xlu1 %1689 }
 0x412   : > { %v1582_v3 = vpop.f32.mrf.mxu0 }
 0x413   : > { %v1647_v4 = vmul.f32 0.35355338, %v1582_v3  ;;  %v1585_v5 = vpop.f32.mrf.mxu1  ;;  %v4131_v37 = vsel %vm1455_vm6, -1e+30, %v1652_v33 }
 0x414   : > { %v1648_v6 = vmul.f32 0.35355338, %v1585_v5  ;;  %v1718_v41 = vsel %vm1222_vm0, %v4131_v37, -inf }
 0x415   : > { %1695 = vmax.xlane.f32.xlu2 %v1694_v8  ;;  %v4101_v12 = vsel %vm1454_vm3, -1e+30, %v1647_v4 }
 0x416   : > { %v1703_v13 = vsel %vm1222_vm0, %v4101_v12, -inf  ;;  %v1672_v14 = vsel %vm1455_vm6, -1e+30, %v1648_v6 }
 0x417   : > { %1704 = vmax.xlane.f32.xlu0 %v1703_v13  ;;  %v1706_v16 = vsel %vm1222_vm0, %v1672_v14, -inf }
 0x418   : > { %1707 = vmax.xlane.f32.xlu1 %v1706_v16  ;;  %v1633_v45 = vpop.f32.mrf.mxu2 }
 0x419   : > { %v1653_v46 = vmul.f32 0.35355338, %v1633_v45 }
 0x41b   : > { %v4147_v49 = vsel %vm1456_vm4, -1e+30, %v1653_v46 }
 0x41c   : > { %v1721_v50 = vsel %vm1222_vm0, %v4147_v49, -inf }
 0x421   : > { %v1636_v18 = vpop.f32.mrf.mxu3 }
 0x422   : > { %v1654_v19 = vmul.f32 0.35355338, %v1636_v18 }
 0x423   : > { %v1588_v20 = vpop.f32.mrf.mxu1 }
 0x424   : > { %v1649_v22 = vmul.f32 0.35355338, %v1588_v20  ;;  %v4112_v54 = vsel %vm1457_vm5, -1e+30, %v1654_v19 }
 0x425   : > { %v1724_v26 = vsel %vm1222_vm0, %v4112_v54, -inf  ;;  %v4165_v47 = vpop.xlane.xlu0 %1683 }
 0x426   : > { %1725 = vmax.xlane.f32.xlu1 %v1724_v26  ;;  %v1673_v29 = vsel %vm1456_vm4, -1e+30, %v1649_v22 }
 0x427   : > { %v1709_v31 = vsel %vm1222_vm0, %v1673_v29, -inf }
 0x428   : > { %1710 = vmax.xlane.f32.xlu2 %v1709_v31 }
 0x42b   : > { %3108 = vrot.lane.b32.xlu0 %v3107_v35, %s3314_s5  ;;  %v1591_v38 = vpop.f32.mrf.mxu1 }
 0x42c   : > { %v1650_v11 = vmul.f32 0.35355338, %v1591_v38 }
 0x42e   : > { %1698 = vmax.xlane.f32.xlu1 %v1697_v43  ;;  %v4140_v44 = vsel %vm1457_vm5, -1e+30, %v1650_v11 }
 0x42f   : > { %v1712_v21 = vsel %vm1222_vm0, %v4140_v44, -inf }
 0x430   : > { %1719 = vmax.xlane.f32.xlu2 %v1718_v41 }
 0x438   : > { %1713 = vmax.xlane.f32.xlu2 %v1712_v21 }
 0x440   : > { %1722 = vmax.xlane.f32.xlu2 %v1721_v50 }
 0x447   : > { %3113 = vrot.lane.b32.xlu1 %v3112_v48, %s3314_s5 }
 0x46a   : > { %v1693_v56 = vpop.xlane.xlu1 %1692 }
 0x46b   : > { %v1731_v57 = vsub.f32 %v4073_v39, %v1693_v56 }
 0x46d   : > { %v1751_v55 = vmul.f32 1.442695, %v1731_v57 }
 0x46f   : > { %3144 = vpow2.f32 %v1751_v55 }
 0x475   : > { %v4160_v1 = vpop.eup %3144 }
 0x476   : > { %v1787_v59 = vsel %vm1222_vm0, %v4160_v1, 0.0 }
 0x477   : > { %1788 = vadd.xlane.f32.xlu2 %v1787_v59 }
 0x480   : > { %v1717_v61 = vpop.xlane.xlu2 %1716 }
 0x481   : > { %v1739_v42 = vsub.f32 %v4080_v58, %v1717_v61 }
 0x482   : > { %v1702_v39 = vpop.xlane.xlu0 %1701 }
 0x483   : > { %v1767_v48 = vmul.f32 1.442695, %v1739_v42  ;;  %v1734_v26 = vsub.f32 %v4087_v62, %v1702_v39 }
 0x485   : > { %3146 = vpow2.f32 %v1767_v48  ;;  %v1757_v38 = vmul.f32 1.442695, %v1734_v26 }
 0x488   : > { %v1696_v0 = vpop.xlane.xlu2 %1695 }
 0x489   : > { %v1732_v3 = vsub.f32 %v4094_v2, %v1696_v0 }
 0x48a   : > { %v1705_v19 = vpop.xlane.xlu0 %1704 }
 0x48b   : > { %v4168_v4 = vpop.eup %3146  ;;  %v1753_v5 = vmul.f32 1.442695, %v1732_v3  ;;  %v1708_v6 = vpop.xlane.xlu1 %1707  ;;  %v1735_v50 = vsub.f32 %v4101_v12, %v1705_v19 }
 0x48c   : > { %v1736_v8 = vsub.f32 %v1672_v14, %v1708_v6  ;;  %v1811_v13 = vsel %vm1222_vm0, %v4168_v4, 0.0 }
 0x48d   : > { %3148 = vpow2.f32 %v1753_v5  ;;  %1812 = vadd.xlane.f32.xlu2 %v1811_v13 }
 0x48e   : > { %v1761_v16 = vmul.f32 1.442695, %v1736_v8 }
 0x490   : > { %3150 = vpow2.f32 %v1761_v16 }
 0x493   : > { %v4172_v58 = vpop.eup %3148 }
 0x494   : > { %v1790_v18 = vsel %vm1222_vm0, %v4172_v58, 0.0 }
 0x495   : > { %1791 = vadd.xlane.f32.xlu2 %v1790_v18 }
 0x496   : > { %v4176_v2 = vpop.eup %3150 }
 0x497   : > { %v1802_v20 = vsel %vm1222_vm0, %v4176_v2, 0.0 }
 0x498   : > { %1803 = vadd.xlane.f32.xlu0 %v1802_v20 }
 0x499   : > { %v1726_v14 = vpop.xlane.xlu1 %1725 }
 0x49a   : > { %v1742_v45 = vsub.f32 %v4112_v54, %v1726_v14  ;;  %v1759_v54 = vmul.f32 1.442695, %v1735_v50  ;;  %v3127_v14 = vpack.i.bf16 %v3905_v28, %v3911_v30 }
 0x49b   : > { %v1711_v22 = vpop.xlane.xlu2 %1710 }
 0x49c   : > { %v1737_v24 = vsub.f32 %v1673_v29, %v1711_v22  ;;  %v1727_v29 = vsub.f32 %v3993_v60, %v1681_v10  ;;  %v1773_v55 = vmul.f32 1.442695, %v1742_v45  ;;  %v3117_v22 = vpack.i.bf16 %v3975_v53, %v3952_v40 }
 0x49d   : > { %v3109_v27 = vpop.permute.xlu0 %3108  ;;  %v1729_v40 = vsub.f32 %v4019_v7, %v4155_v51 }
 0x49e   : > { %v1763_v31 = vmul.f32 1.442695, %v1737_v24  ;;  %v3111_v33 = vunpack.i.h.bf16 %v3109_v27  ;;  %v3110_v35 = vunpack.i.l.bf16 %v3109_v27  ;;  %v3122_v24 = vpack.i.bf16 %v3915_v32, %v3921_v34 }
 0x49f   : > { %v1747_v34 = vmul.f32 1.442695, %v1729_v40 }
 0x4a0   : > { %3152 = vpow2.f32 %v1763_v31  ;;  %1998 = vmatpush.msrb.mxu1 %v3111_v33  ;;  %2053 = vmatpush.msrb.mxu2 %v3110_v35  ;;  %v1728_v33 = vsub.f32 %v4066_v25, %v4165_v47  ;;  %v1730_v25 = vsub.f32 %v4044_v15, %v4157_v52 }
 0x4a1   : > { %v1699_v43 = vpop.xlane.xlu1 %1698  ;;  %3154 = vpow2.f32 %v1757_v38 }
 0x4a2   : > { %v1733_v41 = vsub.f32 %v4125_v36, %v1699_v43  ;;  %v1743_v36 = vmul.f32 1.442695, %v1727_v29  ;;  %v1745_v28 = vmul.f32 1.442695, %v1728_v33  ;;  %v1749_v7 = vmul.f32 1.442695, %v1730_v25 }
 0x4a3   : > { %v1720_v11 = vpop.xlane.xlu2 %1719 }
 0x4a4   : > { %v1755_v21 = vmul.f32 1.442695, %v1733_v41  ;;  %v1740_v46 = vsub.f32 %v4131_v37, %v1720_v11 }
 0x4a6   : > { %v4185_v62 = vpop.eup %3152  ;;  %3156 = vpow2.f32 %v1755_v21  ;;  %v1769_v56 = vmul.f32 1.442695, %v1740_v46 }
 0x4a7   : > { %v1805_v57 = vsel %vm1222_vm0, %v4185_v62, 0.0  ;;  %v4190_v59 = vpop.eup %3154 }
 0x4a8   : > { %3158 = vpow2.f32 %v1769_v56  ;;  %1806 = vadd.xlane.f32.xlu0 %v1805_v57  ;;  %v1796_v42 = vsel %vm1222_vm0, %v4190_v59, 0.0 }
 0x4a9   : > { %3160 = vpow2.f32 %v1773_v55 }
 0x4aa   : > { %3162 = vpow2.f32 %v1743_v36 }
 0x4ab   : > { %v1714_v37 = vpop.xlane.xlu2 %1713  ;;  %3164 = vpow2.f32 %v1759_v54 }
 0x4ac   : > { %v4192_v61 = vpop.eup %3156  ;;  %v1738_v60 = vsub.f32 %v4140_v44, %v1714_v37 }
 0x4ad   : > { %v1793_v12 = vsel %vm1222_vm0, %v4192_v61, 0.0 }
 0x4ae   : > { %v4197_v10 = vpop.eup %3158  ;;  %1794 = vadd.xlane.f32.xlu2 %v1793_v12  ;;  %v1765_v0 = vmul.f32 1.442695, %v1738_v60 }
 0x4af   : > { %v1814_v48 = vsel %vm1222_vm0, %v4197_v10, 0.0  ;;  %v4203_v3 = vpop.eup %3160 }
 0x4b0   : > { %1797 = vadd.xlane.f32.xlu0 %v1796_v42  ;;  %1815 = vadd.xlane.f32.xlu1 %v1814_v48  ;;  %v4205_v44 = vpop.eup %3162  ;;  %3166 = vpow2.f32 %v1765_v0  ;;  %v1820_v5 = vsel %vm1222_vm0, %v4203_v3, 0.0 }
 0x4b1   : > { %v4207_v39 = vpop.eup %3164  ;;  %v1775_v6 = vsel %vm1222_vm0, %v4205_v44, 0.0 }
 0x4b2   : > { %v1799_v8 = vsel %vm1222_vm0, %v4207_v39, 0.0 }
 0x4b3   : > { %v1723_v26 = vpop.xlane.xlu2 %1722 }
 0x4b4   : > { %v1741_v27 = vsub.f32 %v4147_v49, %v1723_v26 }
 0x4b6   : > { %1821 = vadd.xlane.f32.xlu2 %v1820_v5  ;;  %v4215_v16 = vpop.eup %3166  ;;  %v1771_v31 = vmul.f32 1.442695, %v1741_v27 }
 0x4b7   : > { %v1808_v20 = vsel %vm1222_vm0, %v4215_v16, 0.0 }
 0x4b8   : > { %1776 = vadd.xlane.f32.xlu0 %v1775_v6  ;;  %1800 = vadd.xlane.f32.xlu1 %v1799_v8  ;;  %3168 = vpow2.f32 %v1771_v31 }
 0x4b9   : > { %v3114_v13 = vpop.permute.xlu1 %3113  ;;  %3170 = vpow2.f32 %v1745_v28 }
 0x4ba   : > { %v3116_v18 = vunpack.i.h.bf16 %v3114_v13  ;;  %v3115_v19 = vunpack.i.l.bf16 %v3114_v13  ;;  %3172 = vpow2.f32 %v1747_v34 }
 0x4bc   : > { %1946 = vmatpush.msra.mxu0 %v3115_v19  ;;  %1999 = vmatpush.msrb.mxu1 %v3116_v18 }
 0x4be   : > { %1809 = vadd.xlane.f32.xlu2 %v1808_v20  ;;  %v4231_v30 = vpop.eup %3168 }
 0x4bf   : > { %v1817_v32 = vsel %vm1222_vm0, %v4231_v30, 0.0  ;;  %v4237_v35 = vpop.eup %3170 }
 0x4c0   : > { %v1778_v47 = vsel %vm1222_vm0, %v4237_v35, 0.0  ;;  %v4243_v51 = vpop.eup %3172 }
 0x4c1   : > { %v1781_v41 = vsel %vm1222_vm0, %v4243_v51, 0.0 }
 0x4cc   : > { %3128 = vrot.lane.b32.xlu0 %v3127_v14, %s3314_s5 }
 0x4d1   : > { %3118 = vrot.lane.b32.xlu1 %v3117_v22, %s3314_s5 }
 0x4d6   : > { %3123 = vrot.lane.b32.xlu2 %v3122_v24, %s3314_s5 }
 0x4ea   : > { %v1789_v53 = vpop.xlane.xlu2 %1788 }
 0x4fb   : > { %1818 = vadd.xlane.f32.xlu1 %v1817_v32 }
 0x500   : > { %v1813_v49 = vpop.xlane.xlu2 %1812 }
 0x501   : > { %3174 = vrcp.f32 %v1813_v49 }
 0x502   : > { %3176 = vpow2.f32 %v1749_v7 }
 0x503   : > { %1779 = vadd.xlane.f32.xlu1 %v1778_v47 }
 0x507   : > { %v3175_v38 = vpop.eup %3174 }
 0x508   : > { %v1851_v43 = vmul.f32 %v3175_v38, %v4168_v4  ;;  %v4249_v11 = vpop.eup %3176  ;;  %v1792_v45 = vpop.xlane.xlu2 %1791 }
 0x509   : > { %v1784_v15 = vsel %vm1222_vm0, %v4249_v11, 0.0 }
 0x50a   : > { %2877 = vmatmul.msk.f32.vlgmr.msrb.gmra.mxu2 %vm1222_vm0, %v1851_v43 }
 0x50b   : > { %1782 = vadd.xlane.f32.xlu1 %v1781_v41  ;;  %v1804_v52 = vpop.xlane.xlu0 %1803 }
 0x513   : > { %1785 = vadd.xlane.f32.xlu1 %v1784_v15 }
 0x51b   : > { %v1807_v21 = vpop.xlane.xlu0 %1806 }
 0x521   : > { %v1795_v46 = vpop.xlane.xlu2 %1794 }
 0x523   : > { %v1798_v29 = vpop.xlane.xlu0 %1797  ;;  %v1816_v50 = vpop.xlane.xlu1 %1815 }
 0x524   : > { %3178 = vrcp.f32 %v1816_v50 }
 0x525   : > { %3180 = vrcp.f32 %v1789_v53 }
 0x529   : > { %v4253_v4 = vpop.xlane.xlu2 %1821 }
 0x52a   : > { %v3179_v56 = vpop.eup %3178 }
 0x52b   : > { %v1777_v57 = vpop.xlane.xlu0 %1776  ;;  %v1801_v55 = vpop.xlane.xlu1 %1800  ;;  %v4256_v36 = vmul.f32 %v3179_v56, %v4197_v10 }
 0x52c   : > { %3182 = vrcp.f32 %v1777_v57  ;;  %v3181_v54 = vpop.eup %3180 }
 0x52d   : > { %3184 = vrcp.f32 %v1801_v55  ;;  %2878 = vmatmul.msk.f32.gmra.mxu2 %vm1222_vm0, %v4256_v36  ;;  %v1843_v37 = vmul.f32 %v3181_v54, %v4160_v1  ;;  %v2183_v1 = vsel %vm1222_vm0, %v1851_v43, 0.0  ;;  %v2190_v50 = vsel %vm1222_vm0, %v4256_v36, 0.0 }
 0x52e   : > { %3186 = vrcp.f32 %v1792_v45 }
 0x52f   : > { %v2179_v5 = vsel %vm1222_vm0, %v1843_v37, 0.0  ;;  %3188 = vrcp.f32 %v1804_v52 }
 0x530   : > { %3190 = vrcp.f32 %v1807_v21 }
 0x531   : > { %v1810_v60 = vpop.xlane.xlu2 %1809  ;;  %3192 = vrcp.f32 %v1795_v46 }
 0x532   : > { %v3183_v12 = vpop.eup %3182  ;;  %3194 = vrcp.f32 %v1798_v29 }
 0x533   : > { %v3185_v42 = vpop.eup %3184  ;;  %v1839_v48 = vmul.f32 %v3183_v12, %v4205_v44  ;;  %3196 = vrcp.f32 %v1810_v60 }
 0x534   : > { %v1847_v0 = vmul.f32 %v3185_v42, %v4207_v39  ;;  %v3187_v33 = vpop.eup %3186 }
 0x535   : > { %v2178_v6 = vsel %vm1222_vm0, %v1839_v48, 0.0  ;;  %v3189_v28 = vpop.eup %3188  ;;  %v1844_v40 = vmul.f32 %v3187_v33, %v4172_v58 }
 0x536   : > { %v2180_v10 = vadd.f32 %v2179_v5, %v2178_v6  ;;  %v2181_v8 = vsel %vm1222_vm0, %v1847_v0, 0.0  ;;  %v1848_v53 = vmul.f32 %v3189_v28, %v4176_v2  ;;  %v3191_v32 = vpop.eup %3190 }
 0x537   : > { %v3193_v34 = vpop.eup %3192  ;;  %v1849_v25 = vmul.f32 %v3191_v32, %v4185_v62  ;;  %v2186_v45 = vsel %vm1222_vm0, %v1844_v40, 0.0  ;;  %v2130_v32 = vld [vmem:[%s4561_s12 + $0x8] sm:$0xff] }
 0x538   : > { %v2182_v13 = vadd.f32 %v2181_v8, %v2180_v10  ;;  %v1845_v49 = vmul.f32 %v3193_v34, %v4192_v61  ;;  %v3195_v47 = vpop.eup %3194  ;;  %v2188_v46 = vsel %vm1222_vm0, %v1848_v53, 0.0  ;;  %v2129_v34 = vld [vmem:[%s4561_s12] sm:$0xff] }
 0x539   : > { %v3124_v18 = vpop.permute.xlu2 %3123  ;;  %v3197_v58 = vpop.eup %3196  ;;  %v1846_v2 = vmul.f32 %v3195_v47, %v4190_v59  ;;  %v2195_v60 = vsel %vm1222_vm0, %v1849_v25, 0.0 }
 0x53a   : > { %v2184_v19 = vadd.f32 %v2183_v1, %v2182_v13  ;;  %v3125_v20 = vunpack.i.l.bf16 %v3124_v18  ;;  %v3126_v44 = vunpack.i.h.bf16 %v3124_v18  ;;  %v1850_v7 = vmul.f32 %v3197_v58, %v4215_v16 }
 0x53b   : > { %v2193_v55 = vsel %vm1222_vm0, %v1845_v49, 0.0  ;;  %v2200_v6 = vsel %vm1222_vm0, %v1846_v2, 0.0 }
 0x53c   : > { %v2206_v14 = vmul.f32 0.25, %v2184_v19  ;;  %1891 = vmatpush.msra.mxu3 %v3125_v20  ;;  %v2202_v13 = vsel %vm1222_vm0, %v1850_v7, 0.0 }
 0x53e   : > { %2669 = vst.msk [vmem:[%s4270_s1] sm:$0xff] %vm1222_vm0, %v2206_v14  ;;  %v3129_v39 = vpop.permute.xlu0 %3128  ;;  %1892 = vmatpush.msra.mxu3 %v3126_v44 }
 0x53f   : > { %v3130_v22 = vunpack.i.l.bf16 %v3129_v39  ;;  %v3131_v24 = vunpack.i.h.bf16 %v3129_v39 }
 0x541   : > { %1893 = vmatpush.msra.mxu3 %v3130_v22 }
 0x543   : > { %1894 = vmatpush.msra.mxu3 %v3131_v24  ;;  %v3119_v26 = vpop.permute.xlu1 %3118 }
 0x544   : > { %v3121_v27 = vunpack.i.h.bf16 %v3119_v26  ;;  %v3120_v31 = vunpack.i.l.bf16 %v3119_v26  ;;  %2865 = vmatmul.msk.f32.vlgmr.msra.gmra.mxu3 %vm1222_vm0, %v1839_v48 }
 0x546   : > { %1947 = vmatpush.msra.mxu0 %v3120_v31  ;;  %2000 = vmatpush.msrb.mxu1 %v3121_v27 }
 0x547   : > { %2869 = vmatmul.msk.f32.vlgmr.msra.gmra.mxu0 %vm1222_vm0, %v1843_v37  ;;  %2873 = vmatmul.msk.f32.vlgmr.msrb.gmra.mxu1 %vm1222_vm0, %v1847_v0 }
 0x54f   : > { %2870 = vmatmul.msk.f32.gmra.mxu0 %vm1222_vm0, %v1844_v40  ;;  %2874 = vmatmul.msk.f32.gmra.mxu1 %vm1222_vm0, %v1848_v53  ;;  %v2132_v40 = vld [vmem:[%s4561_s12 + $0x18] sm:$0xff]  ;;  %v2131_v53 = vld [vmem:[%s4561_s12 + $0x10] sm:$0xff] }
 0x550   : > { %2161 = vmatpush.msrb.mxu3 %v2132_v40 }
 0x552   : > { %2162 = vmatpush.msrb.mxu3 %v2131_v53 }
 0x554   : > { %2163 = vmatpush.msrb.mxu3 %v2130_v32 }
 0x556   : > { %2164 = vmatpush.msrb.mxu3 %v2129_v34 }
 0x557   : > { %2871 = vmatmul.msk.f32.gmra.mxu0 %vm1222_vm0, %v1845_v49  ;;  %2875 = vmatmul.msk.f32.gmra.mxu1 %vm1222_vm0, %v1849_v25 }
 0x55f   : > { %2872 = vmatmul.msk.f32.gmra.mxu0 %vm1222_vm0, %v1846_v2  ;;  %2876 = vmatmul.msk.f32.gmra.mxu1 %vm1222_vm0, %v1850_v7 }
 0x56e   : > { %v1819_v38 = vpop.xlane.xlu1 %1818 }
 0x56f   : > { %3198 = vrcp.f32 %v1819_v38 }
 0x570   : > { %3200 = vrcp.f32 %v4253_v4 }
 0x575   : > { %v3199_v43 = vpop.eup %3198 }
 0x576   : > { %v1780_v62 = vpop.xlane.xlu1 %1779  ;;  %v1853_v61 = vmul.f32 %v3199_v43, %v4231_v30  ;;  %v3201_v41 = vpop.eup %3200 }
 0x577   : > { %3202 = vrcp.f32 %v1780_v62  ;;  %v1854_v52 = vmul.f32 %v3201_v41, %v4203_v3 }
 0x578   : > { %2879 = vmatmul.msk.f32.gmra.mxu2 %vm1222_vm0, %v1853_v61  ;;  %v2197_v12 = vsel %vm1222_vm0, %v1853_v61, 0.0 }
 0x579   : > { %v2204_v18 = vsel %vm1222_vm0, %v1854_v52, 0.0 }
 0x57d   : > { %v3203_v15 = vpop.eup %3202 }
 0x57e   : > { %v1783_v59 = vpop.xlane.xlu1 %1782  ;;  %v1840_v16 = vmul.f32 %v3203_v15, %v4237_v35 }
 0x57f   : > { %3204 = vrcp.f32 %v1783_v59 }
 0x580   : > { %2866 = vmatmul.msk.f32.gmra.mxu3 %vm1222_vm0, %v1840_v16  ;;  %v2185_v21 = vsel %vm1222_vm0, %v1840_v16, 0.0  ;;  %2880 = vmatmul.msk.f32.gmra.mxu2 %vm1222_vm0, %v1854_v52 }
 0x581   : > { %v2187_v30 = vadd.f32 %v2186_v45, %v2185_v21 }
 0x583   : > { %v2189_v29 = vadd.f32 %v2188_v46, %v2187_v30 }
 0x585   : > { %v3205_v35 = vpop.eup %3204  ;;  %v2191_v4 = vadd.f32 %v2190_v50, %v2189_v29 }
 0x586   : > { %v1786_v3 = vpop.xlane.xlu1 %1785  ;;  %v1841_v56 = vmul.f32 %v3205_v35, %v4243_v51 }
 0x587   : > { %v2207_v57 = vmul.f32 0.25, %v2191_v4  ;;  %3206 = vrcp.f32 %v1786_v3 }
 0x588   : > { %2867 = vmatmul.msk.f32.gmra.mxu3 %vm1222_vm0, %v1841_v56  ;;  %v2192_v54 = vsel %vm1222_vm0, %v1841_v56, 0.0 }
 0x589   : > { %2670 = vst.msk [vmem:[%s4270_s1 + $0x8] sm:$0xff] %vm1222_vm0, %v2207_v57  ;;  %v2194_v37 = vadd.f32 %v2193_v55, %v2192_v54 }
 0x58b   : > { %v2196_v36 = vadd.f32 %v2195_v60, %v2194_v37  ;;  %v3136_v37 = vld [vmem:[%s4562_s13] ss:$0 sm:$0xff] }
 0x58d   : > { %v3207_v42 = vpop.eup %3206  ;;  %v2198_v48 = vadd.f32 %v2197_v12, %v2196_v36  ;;  %v2055_v51 = vpop.f32.mrf.mxu2 }
 0x58e   : > { %2103 = vrot.lane.b32.xlu1 %v2055_v51, %s3315_s9  ;;  %v1842_v0 = vmul.f32 %v3207_v42, %v4249_v11  ;;  %v3242_v42 = vld [vmem:[%s3823_s26] sm:$0xff] }
 0x58f   : > { %v2208_v5 = vmul.f32 0.25, %v2198_v48 }
 0x590   : > { %2868 = vmatmul.msk.f32.gmra.mxu3 %vm1222_vm0, %v1842_v0  ;;  %v2199_v10 = vsel %vm1222_vm0, %v1842_v0, 0.0 }
 0x591   : > { %2671 = vst.msk [vmem:[%s4270_s1 + $0x10] sm:$0xff] %vm1222_vm0, %v2208_v5  ;;  %v2201_v8 = vadd.f32 %v2200_v6, %v2199_v10  ;;  %v3243_v10 = vld [vmem:[%s3823_s26 + $0x8] sm:$0xff] }
 0x593   : > { %v2203_v1 = vadd.f32 %v2202_v13, %v2201_v8 }
 0x595   : > { %v2205_v19 = vadd.f32 %v2204_v18, %v2203_v1 }
 0x597   : > { %v2209_v20 = vmul.f32 0.25, %v2205_v19 }
 0x599   : > { %2672 = vst.msk [vmem:[%s4270_s1 + $0x18] sm:$0xff] %vm1222_vm0, %v2209_v20 }
 0x5b0   : > { %v2058_v22 = vpop.f32.mrf.mxu2 }
 0x5c4   : > { %v1949_v11 = vpop.f32.mrf.mxu0  ;;  %v2002_v14 = vpop.f32.mrf.mxu1 }
 0x5c5   : > { %2087 = vrot.lane.b32.xlu2 %v2002_v14, %s3316_s3  ;;  %2071 = vrot.lane.b32.xlu0 %v1949_v11, %s4588_s2 }
 0x5c7   : > { %v1896_v49 = vpop.f32.mrf.mxu3 }
 0x5cc   : > { %v1952_v44 = vpop.f32.mrf.mxu0  ;;  %v2005_v39 = vpop.f32.mrf.mxu1 }
 0x5cd   : > { %2089 = vrot.lane.b32.xlu2 %v2005_v39, %s3316_s3  ;;  %2073 = vrot.lane.b32.xlu0 %v1952_v44, %s4588_s2 }
 0x5d4   : > { %v1955_v24 = vpop.f32.mrf.mxu0  ;;  %v2008_v26 = vpop.f32.mrf.mxu1 }
 0x5d5   : > { %2105 = vrot.lane.b32.xlu0 %v2058_v22, %s3315_s9  ;;  %2075 = vrot.lane.b32.xlu2 %v1955_v24, %s4588_s2  ;;  %v3245_v22 = vld [vmem:[%s3823_s26 + $0x18] sm:$0xff] }
 0x5dc   : > { %v1958_v27 = vpop.f32.mrf.mxu0  ;;  %v2011_v31 = vpop.f32.mrf.mxu1 }
 0x5dd   : > { %2091 = vrot.lane.b32.xlu0 %v2008_v26, %s3316_s3  ;;  %2077 = vrot.lane.b32.xlu1 %v1958_v27, %s4588_s2  ;;  %v3318_v26 = vmov 32.0   ;;  %s4625_s2 = sld [smem:[#allocation25_spill]] }
 0x5de   : > { %3208 = vrcp.f32 %v3318_v26 }
 0x5e3   : > { %s3266_s23 = scalar_lea.hbm %s4625_s2, 64 }
 0x5e4   : > { %v3209_v27 = vpop.eup %3208 }
 0x5e5   : > { %2093 = vrot.lane.b32.xlu0 %v2011_v31, %s3316_s3  ;;  %v2233_v31 = vmul.f32 32.0, %v3209_v27  ;;  %vm2237_vm9 = vweird.f32 %v3209_v27 }
 0x5fb   : > { %v2061_v33 = vpop.f32.mrf.mxu2 }
 0x5fc   : > { %2107 = vrot.lane.b32.xlu2 %v2061_v33, %s3315_s9  ;;  %v2234_v33 = vsub.f32 1.0, %v2233_v31 }
 0x600   : > { %v2104_v2 = vpop.permute.xlu1 %2103 }
 0x603   : > { %v2064_v28 = vpop.f32.mrf.mxu2  ;;  %v1899_v62 = vpop.f32.mrf.mxu3 }
 0x604   : > { %2109 = vrot.lane.b32.xlu2 %v2064_v28, %s3315_s9 }
 0x60b   : > { %v1902_v21 = vpop.f32.mrf.mxu3 }
 0x613   : > { %v1905_v3 = vpop.f32.mrf.mxu3 }
 0x61f   : > { %v2088_v47 = vpop.permute.xlu2 %2087 }
 0x627   : > { %v2090_v61 = vpop.permute.xlu2 %2089 }
 0x62f   : > { %v2076_v52 = vpop.permute.xlu2 %2075 }
 0x630   : > { %v2117_v30 = vsel %vm1458_vm2, %v1902_v21, %v2076_v52  ;;  %v2332_v21 = vld [vmem:[%s4565_s16 + $0x18] sm:$0xff] }
 0x631   : > { %2361 = vmatpush.msrb.mxu0 %v2332_v21 }
 0x637   : > { %v2072_v25 = vpop.permute.xlu0 %2071 }
 0x638   : > { %v2115_v58 = vsel %vm1458_vm2, %v1896_v49, %v2072_v25 }
 0x639   : > { %v2120_v7 = vsel %vm2119_vm7, %v2115_v58, %v2088_v47 }
 0x63a   : > { %v2125_v38 = vsel %vm2124_vm8, %v2120_v7, %v2104_v2 }
 0x63b   : > { %2881 = vmatmul.msk.f32.vlgmr.msrb.gmra.mxu3 %vm1222_vm0, %v2125_v38 }
 0x63f   : > { %v2074_v43 = vpop.permute.xlu0 %2073 }
 0x640   : > { %v2116_v41 = vsel %vm1458_vm2, %v1899_v62, %v2074_v43 }
 0x641   : > { %v2121_v59 = vsel %vm2119_vm7, %v2116_v41, %v2090_v61 }
 0x647   : > { %v2106_v15 = vpop.permute.xlu0 %2105 }
 0x648   : > { %v2126_v16 = vsel %vm2124_vm8, %v2121_v59, %v2106_v15 }
 0x649   : > { %2882 = vmatmul.msk.f32.gmra.mxu3 %vm1222_vm0, %v2126_v16 }
 0x64f   : > { %v2092_v45 = vpop.permute.xlu0 %2091  ;;  %v2078_v35 = vpop.permute.xlu1 %2077 }
 0x650   : > { %v2122_v46 = vsel %vm2119_vm7, %v2117_v30, %v2092_v45  ;;  %v2118_v56 = vsel %vm1458_vm2, %v1905_v3, %v2078_v35  ;;  %v2331_v30 = vld [vmem:[%s4565_s16 + $0x10] sm:$0xff] }
 0x651   : > { %2362 = vmatpush.msrb.mxu0 %v2331_v30 }
 0x656   : > { %v2108_v29 = vpop.permute.xlu2 %2107 }
 0x657   : > { %v2127_v50 = vsel %vm2124_vm8, %v2122_v46, %v2108_v29  ;;  %v2094_v4 = vpop.permute.xlu0 %2093  ;;  %v2330_v46 = vld [vmem:[%s4565_s16 + $0x8] sm:$0xff]  ;;  %v2329_v29 = vld [vmem:[%s4565_s16] sm:$0xff] }
 0x658   : > { %2883 = vmatmul.msk.f32.gmra.mxu3 %vm1222_vm0, %v2127_v50  ;;  %v2123_v57 = vsel %vm2119_vm7, %v2118_v56, %v2094_v4  ;;  %2363 = vmatpush.msrb.mxu0 %v2330_v46 }
 0x65a   : > { %2364 = vmatpush.msrb.mxu0 %v2329_v29 }
 0x65e   : > { %v2110_v55 = vpop.permute.xlu2 %2109 }
 0x65f   : > { %v2128_v54 = vsel %vm2124_vm8, %v2123_v57, %v2110_v55 }
 0x660   : > { %2884 = vmatmul.msk.f32.gmra.mxu3 %vm1222_vm0, %v2128_v54 }
 0x6be   : > { %v2166_v60 = vpop.f32.mrf.mxu3 }
 0x6bf   : > { %v2167_v36 = vadd.f32 %v3136_v37, %v2166_v60 }
 0x6c1   : > { %v2210_v12 = vadd.f32 %v2167_v36, %v3861_v63  ;;  %v3244_v63 = vld [vmem:[%s3823_s26 + $0x10] sm:$0xff]  ;;  %s2693_s26 = scalar_lea.hbm %s4625_s2, %s2910_s7 }
 0x6c2   : > { %s2696_s24 = sshll.u32 %s2693_s26, 4  ;;  %s2697_s24 = int_to_ptr.hbm [resolvable:$true] %s2696_s24 }
 0x6c3   : > { %v2214_v48 = vadd.f32 %v3242_v42, %v2210_v12  ;;  %v3137_v42 = vld [vmem:[%s4563_s14] ss:$0 sm:$0xff]  ;;  %s3260_s8 = sshra.s32 %s2697_s24, 4  ;;  %s3261_s8 = int_to_ptr.hbm [resolvable:$true] %s3260_s8 }
 0x6c4   : > { %s3262_s5 = scalar_lea.hbm %s3261_s8, 32  ;;  %p3267_p0 = scmp.lt.s32.totalorder %s3261_s8, %s4625_s2 }
 0x6c5   : > { %v2220_v51 = vsel %vm1222_vm0, %v2214_v48, 0.0  ;;  %p3263_p11 = scmp.ne.s32.totalorder %s3261_s8, %s3262_s5  ;;  %p3268_p1 = scmp.lt.s32.totalorder %s3266_s23, %s3262_s5 }
 0x6c6   : > { %2221 = vadd.xlane.f32.xlu1 %v2220_v51 }
 0x6c7   : > { %p3264_p12 = pnand %p3263_p11, %p3491_p5  ;;  %p3269_p2 = por %p3268_p1, %p3267_p0 }
 0x6c9   : > { %p3265_p13 = pneg %p3264_p12 }
 0x6cb   : > { %p3270_p3 = pnand %p3269_p2, %p3265_p13 }
 0x6cc   : > { %v2169_v0 = vpop.f32.mrf.mxu3 }
 0x6cd   : > { %v2170_v5 = vadd.f32 %v3136_v37, %v2169_v0  ;;  %v3138_v0 = vld [vmem:[%s4564_s15] ss:$0 sm:$0xff] }
 0x6cf   : > { %v2211_v6 = vadd.f32 %v2170_v5, %v3879_v9 }
 0x6d1   : > { %v2215_v8 = vadd.f32 %v3243_v10, %v2211_v6 }
 0x6d3   : > { %v2223_v13 = vsel %vm1222_vm0, %v2215_v8, 0.0 }
 0x6d4   : > { %2224 = vadd.xlane.f32.xlu0 %v2223_v13 }
 0x6db   : > { %v2172_v1 = vpop.f32.mrf.mxu3 }
 0x6dc   : > { %v2173_v18 = vadd.f32 %v3136_v37, %v2172_v1 }
 0x6de   : > { %v2212_v19 = vadd.f32 %v2173_v18, %v3890_v17  ;;  %v2235_v17 = vmul.f32 %v3209_v27, %v2234_v33 }
 0x6e0   : > { %v2216_v20 = vadd.f32 %v3244_v63, %v2212_v19  ;;  %v2236_v28 = vadd.f32 %v3209_v27, %v2235_v17 }
 0x6e2   : > { %v2226_v11 = vsel %vm1222_vm0, %v2216_v20, 0.0  ;;  %v4370_v40 = vsel %vm2237_vm9, %v3209_v27, %v2236_v28 }
 0x6e3   : > { %2227 = vadd.xlane.f32.xlu2 %v2226_v11  ;;  %v2175_v14 = vpop.f32.mrf.mxu3 }
 0x6e4   : > { %v2176_v44 = vadd.f32 %v3136_v37, %v2175_v14  ;;  %v2385_v14 = vld [vmem:[%s4567_s18 + $0x18] sm:$0xff] }
 0x6e5   : > { %2414 = vmatpush.msra.mxu1 %v2385_v14 }
 0x6e6   : > { %v2213_v39 = vadd.f32 %v2176_v44, %v3897_v23 }
 0x6e8   : > { %v2217_v9 = vadd.f32 %v3245_v22, %v2213_v39 }
 0x6ea   : > { %v2229_v24 = vsel %vm1222_vm0, %v2217_v9, 0.0 }
 0x6eb   : > { %2230 = vadd.xlane.f32.xlu1 %v2229_v24 }
 0x739   : > { %v2222_v53 = vpop.xlane.xlu1 %2221 }
 0x73a   : > { %v2239_v32 = vmul.f32 %v4370_v40, %v2222_v53 }
 0x73c   : > { %v2243_v34 = vsub.f32 %v2214_v48, %v2239_v32 }
 0x73e   : > { %v2247_v23 = vmul.f32 %v2243_v34, %v2243_v34 }
 0x740   : > { %v2251_v49 = vsel %vm1222_vm0, %v2247_v23, 0.0 }
 0x741   : > { %2252 = vadd.xlane.f32.xlu2 %v2251_v49 }
 0x747   : > { %v2225_v25 = vpop.xlane.xlu0 %2224 }
 0x748   : > { %v2240_v47 = vmul.f32 %v4370_v40, %v2225_v25 }
 0x74a   : > { %v4375_v58 = vsub.f32 %v2215_v8, %v2240_v47 }
 0x74c   : > { %v2248_v2 = vmul.f32 %v4375_v58, %v4375_v58 }
 0x74e   : > { %v2254_v7 = vsel %vm1222_vm0, %v2248_v2, 0.0 }
 0x74f   : > { %2255 = vadd.xlane.f32.xlu0 %v2254_v7 }
 0x756   : > { %v2228_v38 = vpop.xlane.xlu2 %2227 }
 0x757   : > { %v2241_v43 = vmul.f32 %v4370_v40, %v2228_v38 }
 0x759   : > { %v4381_v62 = vsub.f32 %v2216_v20, %v2241_v43 }
 0x75b   : > { %v2249_v61 = vmul.f32 %v4381_v62, %v4381_v62 }
 0x75d   : > { %v2257_v41 = vsel %vm1222_vm0, %v2249_v61, 0.0 }
 0x75e   : > { %2258 = vadd.xlane.f32.xlu1 %v2257_v41  ;;  %v2231_v15 = vpop.xlane.xlu1 %2230 }
 0x75f   : > { %v2242_v59 = vmul.f32 %v4370_v40, %v2231_v15 }
 0x761   : > { %v4387_v16 = vsub.f32 %v2217_v9, %v2242_v59 }
 0x763   : > { %v2250_v52 = vmul.f32 %v4387_v16, %v4387_v16 }
 0x765   : > { %v2260_v45 = vsel %vm1222_vm0, %v2250_v52, 0.0  ;;  %v2383_v52 = vld [vmem:[%s4567_s18 + $0x8] sm:$0xff] }
 0x766   : > { %2261 = vadd.xlane.f32.xlu2 %v2260_v45  ;;  %v2382_v45 = vld [vmem:[%s4567_s18] sm:$0xff] }
 0x7b4   : > { %v2253_v50 = vpop.xlane.xlu2 %2252 }
 0x7b5   : > { %v2263_v35 = vmul.f32 %v2253_v50, %v4370_v40 }
 0x7b7   : > { %v2267_v4 = vadd.f32 1e-05, %v2263_v35 }
 0x7b9   : > { %3210 = vrsqrt.f32 %v2267_v4  ;;  %vm2277_vm11 = vweird.f32 %v2267_v4 }
 0x7bf   : > { %v3211_v3 = vpop.eup %3210 }
 0x7c0   : > { %v2272_v56 = vmul.f32 %v3211_v3, %v2267_v4  ;;  %vm2278_vm10 = vweird.f32 %v3211_v3 }
 0x7c1   : > { %vm2279_vm12 = vmor %vm2277_vm11, %vm2278_vm10 }
 0x7c2   : > { %v2273_v57 = vmul.f32 %v3211_v3, %v2272_v56  ;;  %v2256_v55 = vpop.xlane.xlu0 %2255 }
 0x7c3   : > { %v2264_v54 = vmul.f32 %v2256_v55, %v4370_v40 }
 0x7c4   : > { %v2274_v37 = vmul.f32 0.5, %v2273_v57 }
 0x7c5   : > { %v2268_v60 = vadd.f32 1e-05, %v2264_v54 }
 0x7c6   : > { %v2275_v36 = vsub.f32 1.5, %v2274_v37  ;;  %v3140_v37 = vld [vmem:[%s4568_s19] ss:$0 sm:$0xff] }
 0x7c7   : > { %3212 = vrsqrt.f32 %v2268_v60  ;;  %vm2287_vm14 = vweird.f32 %v2268_v60 }
 0x7c8   : > { %v2276_v12 = vmul.f32 %v3211_v3, %v2275_v36 }
 0x7ca   : > { %v2280_v48 = vsel %vm2279_vm12, %v3211_v3, %v2276_v12 }
 0x7cb   : > { %v2311_v51 = vmul.f32 %v2280_v48, %v2243_v34 }
 0x7cd   : > { %v3213_v5 = vpop.eup %3212  ;;  %v2318_v6 = vmul.f32 %v3137_v42, %v2311_v51 }
 0x7ce   : > { %v2282_v10 = vmul.f32 %v3213_v5, %v2268_v60  ;;  %vm2288_vm13 = vweird.f32 %v3213_v5 }
 0x7cf   : > { %v4412_v8 = vadd.f32 %v3138_v0, %v2318_v6  ;;  %vm2289_vm15 = vmor %vm2287_vm14, %vm2288_vm13 }
 0x7d0   : > { %v2283_v13 = vmul.f32 %v3213_v5, %v2282_v10 }
 0x7d1   : > { %2885 = vmatmul.msk.f32.vlgmr.msrb.gmra.mxu0 %vm1222_vm0, %v4412_v8  ;;  %v2259_v1 = vpop.xlane.xlu1 %2258 }
 0x7d2   : > { %v2284_v18 = vmul.f32 0.5, %v2283_v13  ;;  %v2265_v19 = vmul.f32 %v2259_v1, %v4370_v40 }
 0x7d4   : > { %v2285_v63 = vsub.f32 1.5, %v2284_v18  ;;  %v2269_v20 = vadd.f32 1e-05, %v2265_v19 }
 0x7d6   : > { %v2286_v11 = vmul.f32 %v3213_v5, %v2285_v63  ;;  %3214 = vrsqrt.f32 %v2269_v20  ;;  %vm2297_vm2 = vweird.f32 %v2269_v20 }
 0x7d8   : > { %v2290_v44 = vsel %vm2289_vm15, %v3213_v5, %v2286_v11 }
 0x7d9   : > { %v2262_v39 = vpop.xlane.xlu2 %2261  ;;  %v2312_v22 = vmul.f32 %v2290_v44, %v4375_v58 }
 0x7da   : > { %v2266_v9 = vmul.f32 %v2262_v39, %v4370_v40 }
 0x7db   : > { %v2319_v24 = vmul.f32 %v3137_v42, %v2312_v22 }
 0x7dc   : > { %v3215_v26 = vpop.eup %3214  ;;  %v2270_v27 = vadd.f32 1e-05, %v2266_v9 }
 0x7dd   : > { %v2292_v31 = vmul.f32 %v3215_v26, %v2269_v20  ;;  %v2326_v33 = vadd.f32 %v3138_v0, %v2319_v24  ;;  %vm2298_vm1 = vweird.f32 %v3215_v26 }
 0x7de   : > { %3216 = vrsqrt.f32 %v2270_v27  ;;  %vm2299_vm3 = vmor %vm2297_vm2, %vm2298_vm1  ;;  %vm2307_vm5 = vweird.f32 %v2270_v27 }
 0x7df   : > { %v2293_v17 = vmul.f32 %v3215_v26, %v2292_v31  ;;  %2886 = vmatmul.msk.f32.gmra.mxu0 %vm1222_vm0, %v2326_v33 }
 0x7e1   : > { %v2294_v28 = vmul.f32 0.5, %v2293_v17 }
 0x7e3   : > { %v2295_v53 = vsub.f32 1.5, %v2294_v28 }
 0x7e4   : > { %v3217_v32 = vpop.eup %3216 }
 0x7e5   : > { %v2296_v34 = vmul.f32 %v3215_v26, %v2295_v53  ;;  %v2302_v23 = vmul.f32 %v3217_v32, %v2270_v27  ;;  %vm2308_vm4 = vweird.f32 %v3217_v32 }
 0x7e6   : > { %vm2309_vm6 = vmor %vm2307_vm5, %vm2308_vm4 }
 0x7e7   : > { %v2300_v49 = vsel %vm2299_vm3, %v3215_v26, %v2296_v34  ;;  %v2303_v25 = vmul.f32 %v3217_v32, %v2302_v23 }
 0x7e8   : > { %v2313_v47 = vmul.f32 %v2300_v49, %v4381_v62  ;;  %v2384_v62 = vld [vmem:[%s4567_s18 + $0x10] sm:$0xff] }
 0x7e9   : > { %v2304_v58 = vmul.f32 0.5, %v2303_v25  ;;  %2415 = vmatpush.msra.mxu1 %v2384_v62 }
 0x7ea   : > { %v2320_v2 = vmul.f32 %v3137_v42, %v2313_v47  ;;  %v2542_v47 = vld [vmem:[%s4571_s22 + $0x18] sm:$0xff] }
 0x7eb   : > { %v2305_v7 = vsub.f32 1.5, %v2304_v58  ;;  %2416 = vmatpush.msra.mxu1 %v2383_v52  ;;  %2571 = vmatpush.msra.mxu2 %v2542_v47  ;;  %v2541_v58 = vld [vmem:[%s4571_s22 + $0x10] sm:$0xff] }
 0x7ec   : > { %v2327_v38 = vadd.f32 %v3138_v0, %v2320_v2  ;;  %v2540_v2 = vld [vmem:[%s4571_s22 + $0x8] sm:$0xff] }
 0x7ed   : > { %v2306_v43 = vmul.f32 %v3217_v32, %v2305_v7  ;;  %2417 = vmatpush.msra.mxu1 %v2382_v45  ;;  %2572 = vmatpush.msra.mxu2 %v2541_v58  ;;  %v2539_v7 = vld [vmem:[%s4571_s22] sm:$0xff] }
 0x7ee   : > { %2887 = vmatmul.msk.f32.gmra.mxu0 %vm1222_vm0, %v2327_v38 }
 0x7ef   : > { %v2310_v61 = vsel %vm2309_vm6, %v3217_v32, %v2306_v43  ;;  %2573 = vmatpush.msra.mxu2 %v2540_v2 }
 0x7f0   : > { %v2314_v41 = vmul.f32 %v2310_v61, %v4387_v16  ;;  %v3139_v16 = vld [vmem:[%s4566_s17] ss:$0 sm:$0xff] }
 0x7f1   : > { %2574 = vmatpush.msra.mxu2 %v2539_v7 }
 0x7f2   : > { %v2321_v15 = vmul.f32 %v3137_v42, %v2314_v41 }
 0x7f4   : > { %v2328_v59 = vadd.f32 %v3138_v0, %v2321_v15 }
 0x7f6   : > { %2888 = vmatmul.msk.f32.gmra.mxu0 %vm1222_vm0, %v2328_v59 }
 0x84e   : > { %v2366_v21 = vpop.f32.mrf.mxu0 }
 0x84f   : > { %v2367_v30 = vadd.f32 %v3139_v16, %v2366_v21 }
 0x851   : > { %v2378_v46 = vmax.f32 %v2367_v30, 0.0 }
 0x853   : > { %2889 = vmatmul.msk.f32.vlgmr.msra.gmra.mxu1 %vm1222_vm0, %v2378_v46  ;;  %v3141_v46 = vld [vmem:[%s4569_s20] ss:$0 sm:$0xff] }
 0x85c   : > { %v2369_v29 = vpop.f32.mrf.mxu0 }
 0x85d   : > { %v2370_v50 = vadd.f32 %v3139_v16, %v2369_v29 }
 0x85f   : > { %v2379_v35 = vmax.f32 %v2370_v50, 0.0 }
 0x861   : > { %2890 = vmatmul.msk.f32.gmra.mxu1 %vm1222_vm0, %v2379_v35  ;;  %v3142_v35 = vld [vmem:[%s4570_s21] ss:$0 sm:$0xff] }
 0x86b   : > { %v2372_v4 = vpop.f32.mrf.mxu0 }
 0x86c   : > { %v2373_v3 = vadd.f32 %v3139_v16, %v2372_v4 }
 0x86e   : > { %v2380_v56 = vmax.f32 %v2373_v3, 0.0 }
 0x870   : > { %2891 = vmatmul.msk.f32.gmra.mxu1 %vm1222_vm0, %v2380_v56 }
 0x873   : > { %v2375_v57 = vpop.f32.mrf.mxu0 }
 0x874   : > { %v2376_v55 = vadd.f32 %v3139_v16, %v2375_v57 }
 0x876   : > { %v2381_v54 = vmax.f32 %v2376_v55, 0.0 }
 0x878   : > { %2892 = vmatmul.msk.f32.gmra.mxu1 %vm1222_vm0, %v2381_v54 }
 0x8d0   : > { %v2419_v60 = vpop.f32.mrf.mxu1 }
 0x8d1   : > { %v2420_v36 = vadd.f32 %v3140_v37, %v2419_v60 }
 0x8d3   : > { %v2431_v12 = vadd.f32 %v2420_v36, %v4412_v8 }
 0x8d5   : > { %v2437_v42 = vsel %vm1222_vm0, %v2431_v12, 0.0 }
 0x8d6   : > { %2438 = vadd.xlane.f32.xlu0 %v2437_v42 }
 0x8de   : > { %v2422_v48 = vpop.f32.mrf.mxu1 }
 0x8df   : > { %v2423_v51 = vadd.f32 %v3140_v37, %v2422_v48 }
 0x8e1   : > { %v2432_v0 = vadd.f32 %v2423_v51, %v2326_v33 }
 0x8e3   : > { %v2440_v5 = vsel %vm1222_vm0, %v2432_v0, 0.0 }
 0x8e4   : > { %2441 = vadd.xlane.f32.xlu1 %v2440_v5 }
 0x8ed   : > { %v2425_v6 = vpop.f32.mrf.mxu1 }
 0x8ee   : > { %v2426_v10 = vadd.f32 %v3140_v37, %v2425_v6 }
 0x8f0   : > { %v2433_v13 = vadd.f32 %v2426_v10, %v2327_v38 }
 0x8f2   : > { %v2443_v1 = vsel %vm1222_vm0, %v2433_v13, 0.0 }
 0x8f3   : > { %2444 = vadd.xlane.f32.xlu2 %v2443_v1 }
 0x8f5   : > { %v2428_v18 = vpop.f32.mrf.mxu1 }
 0x8f6   : > { %v2429_v19 = vadd.f32 %v3140_v37, %v2428_v18 }
 0x8f8   : > { %v2434_v63 = vadd.f32 %v2429_v19, %v2328_v59 }
 0x8fa   : > { %v2446_v8 = vsel %vm1222_vm0, %v2434_v63, 0.0 }
 0x8fb   : > { %2447 = vadd.xlane.f32.xlu0 %v2446_v8 }
 0x949   : > { %v2439_v20 = vpop.xlane.xlu0 %2438 }
 0x94a   : > { %v2449_v11 = vmul.f32 %v2439_v20, %v4370_v40 }
 0x94c   : > { %v2453_v14 = vsub.f32 %v2431_v12, %v2449_v11 }
 0x94e   : > { %v2457_v44 = vmul.f32 %v2453_v14, %v2453_v14 }
 0x950   : > { %v2461_v39 = vsel %vm1222_vm0, %v2457_v44, 0.0 }
 0x951   : > { %2462 = vadd.xlane.f32.xlu1 %v2461_v39 }
 0x957   : > { %v2442_v22 = vpop.xlane.xlu1 %2441 }
 0x958   : > { %v2450_v9 = vmul.f32 %v2442_v22, %v4370_v40 }
 0x95a   : > { %v4454_v24 = vsub.f32 %v2432_v0, %v2450_v9 }
 0x95c   : > { %v2458_v26 = vmul.f32 %v4454_v24, %v4454_v24 }
 0x95e   : > { %v2464_v27 = vsel %vm1222_vm0, %v2458_v26, 0.0 }
 0x95f   : > { %2465 = vadd.xlane.f32.xlu2 %v2464_v27 }
 0x966   : > { %v2445_v31 = vpop.xlane.xlu2 %2444 }
 0x967   : > { %v2451_v33 = vmul.f32 %v2445_v31, %v4370_v40 }
 0x969   : > { %v4460_v17 = vsub.f32 %v2433_v13, %v2451_v33 }
 0x96b   : > { %v2459_v28 = vmul.f32 %v4460_v17, %v4460_v17 }
 0x96d   : > { %v2467_v53 = vsel %vm1222_vm0, %v2459_v28, 0.0 }
 0x96e   : > { %v2448_v32 = vpop.xlane.xlu0 %2447  ;;  %2468 = vadd.xlane.f32.xlu0 %v2467_v53 }
 0x96f   : > { %v2452_v34 = vmul.f32 %v2448_v32, %v4370_v40 }
 0x971   : > { %v4466_v23 = vsub.f32 %v2434_v63, %v2452_v34 }
 0x973   : > { %v2460_v49 = vmul.f32 %v4466_v23, %v4466_v23 }
 0x975   : > { %v2470_v25 = vsel %vm1222_vm0, %v2460_v49, 0.0 }
 0x976   : > { %2471 = vadd.xlane.f32.xlu1 %v2470_v25 }
 0x9c4   : > { %v2463_v38 = vpop.xlane.xlu1 %2462 }
 0x9c5   : > { %v2473_v43 = vmul.f32 %v2463_v38, %v4370_v40 }
 0x9c7   : > { %v2477_v61 = vadd.f32 1e-05, %v2473_v43 }
 0x9c9   : > { %3218 = vrsqrt.f32 %v2477_v61  ;;  %vm2487_vm8 = vweird.f32 %v2477_v61 }
 0x9cf   : > { %v3219_v41 = vpop.eup %3218 }
 0x9d0   : > { %v2482_v15 = vmul.f32 %v3219_v41, %v2477_v61  ;;  %vm2488_vm7 = vweird.f32 %v3219_v41 }
 0x9d1   : > { %vm2489_vm9 = vmor %vm2487_vm8, %vm2488_vm7 }
 0x9d2   : > { %v2483_v59 = vmul.f32 %v3219_v41, %v2482_v15  ;;  %v2466_v62 = vpop.xlane.xlu2 %2465 }
 0x9d3   : > { %v2474_v52 = vmul.f32 %v2466_v62, %v4370_v40 }
 0x9d4   : > { %v2484_v45 = vmul.f32 0.5, %v2483_v59 }
 0x9d5   : > { %v2478_v16 = vadd.f32 1e-05, %v2474_v52 }
 0x9d6   : > { %v2485_v21 = vsub.f32 1.5, %v2484_v45 }
 0x9d7   : > { %3220 = vrsqrt.f32 %v2478_v16  ;;  %vm2497_vm11 = vweird.f32 %v2478_v16 }
 0x9d8   : > { %v2486_v30 = vmul.f32 %v3219_v41, %v2485_v21 }
 0x9da   : > { %v2490_v29 = vsel %vm2489_vm9, %v3219_v41, %v2486_v30 }
 0x9db   : > { %v2521_v50 = vmul.f32 %v2490_v29, %v2453_v14 }
 0x9dd   : > { %v3221_v4 = vpop.eup %3220  ;;  %v2528_v3 = vmul.f32 %v3141_v46, %v2521_v50 }
 0x9de   : > { %v2492_v56 = vmul.f32 %v3221_v4, %v2478_v16  ;;  %vm2498_vm10 = vweird.f32 %v3221_v4 }
 0x9df   : > { %v2535_v57 = vadd.f32 %v3142_v35, %v2528_v3  ;;  %vm2499_vm12 = vmor %vm2497_vm11, %vm2498_vm10 }
 0x9e0   : > { %v2493_v55 = vmul.f32 %v3221_v4, %v2492_v56 }
 0x9e1   : > { %v2469_v54 = vpop.xlane.xlu0 %2468  ;;  %2893 = vmatmul.msk.f32.vlgmr.msra.gmra.mxu2 %vm1222_vm0, %v2535_v57 }
 0x9e2   : > { %v2494_v37 = vmul.f32 0.5, %v2493_v55  ;;  %v2475_v60 = vmul.f32 %v2469_v54, %v4370_v40 }
 0x9e4   : > { %v2495_v36 = vsub.f32 1.5, %v2494_v37  ;;  %v2479_v12 = vadd.f32 1e-05, %v2475_v60 }
 0x9e6   : > { %v2496_v42 = vmul.f32 %v3221_v4, %v2495_v36  ;;  %3222 = vrsqrt.f32 %v2479_v12  ;;  %vm2507_vm14 = vweird.f32 %v2479_v12 }
 0x9e8   : > { %v2500_v48 = vsel %vm2499_vm12, %v3221_v4, %v2496_v42 }
 0x9e9   : > { %v2472_v51 = vpop.xlane.xlu1 %2471  ;;  %v2522_v0 = vmul.f32 %v2500_v48, %v4454_v24 }
 0x9ea   : > { %v2476_v5 = vmul.f32 %v2472_v51, %v4370_v40 }
 0x9eb   : > { %v2529_v6 = vmul.f32 %v3141_v46, %v2522_v0 }
 0x9ec   : > { %v3223_v10 = vpop.eup %3222  ;;  %v2480_v13 = vadd.f32 1e-05, %v2476_v5 }
 0x9ed   : > { %v2502_v1 = vmul.f32 %v3223_v10, %v2479_v12  ;;  %v2536_v18 = vadd.f32 %v3142_v35, %v2529_v6  ;;  %vm2508_vm13 = vweird.f32 %v3223_v10 }
 0x9ee   : > { %3224 = vrsqrt.f32 %v2480_v13  ;;  %vm2509_vm15 = vmor %vm2507_vm14, %vm2508_vm13  ;;  %vm2517_vm2 = vweird.f32 %v2480_v13 }
 0x9ef   : > { %v2503_v19 = vmul.f32 %v3223_v10, %v2502_v1  ;;  %2894 = vmatmul.msk.f32.gmra.mxu2 %vm1222_vm0, %v2536_v18 }
 0x9f1   : > { %v2504_v63 = vmul.f32 0.5, %v2503_v19 }
 0x9f3   : > { %v2505_v8 = vsub.f32 1.5, %v2504_v63 }
 0x9f4   : > { %v3225_v20 = vpop.eup %3224 }
 0x9f5   : > { %v2506_v11 = vmul.f32 %v3223_v10, %v2505_v8  ;;  %v2512_v14 = vmul.f32 %v3225_v20, %v2480_v13  ;;  %vm2518_vm1 = vweird.f32 %v3225_v20 }
 0x9f6   : > { %vm2519_vm3 = vmor %vm2517_vm2, %vm2518_vm1 }
 0x9f7   : > { %v2510_v44 = vsel %vm2509_vm15, %v3223_v10, %v2506_v11  ;;  %v2513_v39 = vmul.f32 %v3225_v20, %v2512_v14 }
 0x9f8   : > { %v2523_v40 = vmul.f32 %v2510_v44, %v4460_v17 }
 0x9f9   : > { %v2514_v22 = vmul.f32 0.5, %v2513_v39 }
 0x9fa   : > { %v2530_v9 = vmul.f32 %v3141_v46, %v2523_v40 }
 0x9fb   : > { %v2515_v24 = vsub.f32 1.5, %v2514_v22 }
 0x9fc   : > { %v2537_v26 = vadd.f32 %v3142_v35, %v2530_v9 }
 0x9fd   : > { %v2516_v27 = vmul.f32 %v3225_v20, %v2515_v24 }
 0x9fe   : > { %2895 = vmatmul.msk.f32.gmra.mxu2 %vm1222_vm0, %v2537_v26 }
 0x9ff   : > { %v2520_v31 = vsel %vm2519_vm3, %v3225_v20, %v2516_v27 }
 0xa00   : > { %v2524_v33 = vmul.f32 %v2520_v31, %v4466_v23 }
 0xa02   : > { %v2531_v28 = vmul.f32 %v3141_v46, %v2524_v33 }
 0xa04   : > { %v2538_v53 = vadd.f32 %v3142_v35, %v2531_v28 }
 0xa06   : > { %2896 = vmatmul.msk.f32.gmra.mxu2 %vm1222_vm0, %v2538_v53 }
 0xa07   : > { %3273 = shalt.err (!%p3270_p3)
}
 0xa08   : > { %s3319_s27 = smov 128   ;;  %s4626_s1 = smov 8   ;;  %v3143_v17 = vld [vmem:[#allocation2] ss:$0 sm:$0xff]  ;;  %vm2664_vm6 = vcmask 7168  }
 0xa09   : > { %2939 = dma.vmem_to_hbm [thread:$0]  (%p3491_p5), %s2695_s29, 512, %s2697_s24, %s2679_s6, %s3319_s27, %s3319_s27, %s4626_s1  }
 0xa0a   : > { %s4627_s28 = sld [smem:[#allocation24_spill]] }
 0xa10   : > { %s4522_s0 = scalar_lea.vmem %s4627_s28, %s3799_s4 }
 0xa64   : > { %v2576_v32 = vpop.f32.mrf.mxu2 }
 0xa65   : > { %v2577_v34 = vadd.f32 %v3143_v17, %v2576_v32 }
 0xa67   : > { %v2897_v23 = vmul.f32 -1.442695, %v2577_v34 }
 0xa69   : > { %3226 = vpow2.f32 %v2897_v23 }
 0xa6f   : > { %v3227_v49 = vpop.eup %3226 }
 0xa70   : > { %v2600_v25 = vadd.f32 1.0, %v3227_v49 }
 0xa72   : > { %3228 = vrcp.f32 %v2600_v25  ;;  %v2579_v47 = vpop.f32.mrf.mxu2  ;;  %v2615_v61 = vand.u32 2147483648, %v2600_v25  ;;  %v2613_v59 = vand.u32 2147483647, %v2600_v25  ;;  %vm2609_vm4 = vweird.f32 %v2600_v25 }
 0xa73   : > { %v2580_v58 = vadd.f32 %v3143_v17, %v2579_v47 }
 0xa74   : > { %v2616_v45 = vor.u32 1.1754944e-38, %v2615_v61  ;;  %vm2614_vm7 = vcmp.eq.f32.partialorder %v2613_v59, 8.507059e+37 }
 0xa75   : > { %v2898_v2 = vmul.f32 -1.442695, %v2580_v58 }
 0xa77   : > { %3230 = vpow2.f32 %v2898_v2 }
 0xa78   : > { %v3229_v7 = vpop.eup %3228 }
 0xa79   : > { %v2605_v38 = vmul.f32 %v3229_v7, %v2600_v25  ;;  %vm2610_vm0 = vweird.f32 %v3229_v7 }
 0xa7a   : > { %vm2611_vm5 = vmor %vm2609_vm4, %vm2610_vm0 }
 0xa7b   : > { %v2606_v43 = vsub.f32 1.0, %v2605_v38 }
 0xa7d   : > { %v3231_v41 = vpop.eup %3230  ;;  %v2607_v15 = vmul.f32 %v3229_v7, %v2606_v43 }
 0xa7e   : > { %v2601_v62 = vadd.f32 1.0, %v3231_v41 }
 0xa7f   : > { %v2608_v52 = vadd.f32 %v3229_v7, %v2607_v15 }
 0xa80   : > { %3232 = vrcp.f32 %v2601_v62  ;;  %v2630_v56 = vand.u32 2147483648, %v2601_v62  ;;  %v2628_v54 = vand.u32 2147483647, %v2601_v62  ;;  %vm2624_vm9 = vweird.f32 %v2601_v62 }
 0xa81   : > { %v2612_v16 = vsel %vm2611_vm5, %v3229_v7, %v2608_v52  ;;  %v2582_v21 = vpop.f32.mrf.mxu2 }
 0xa82   : > { %v2617_v30 = vsel %vm2614_vm7, %v2616_v45, %v2612_v16  ;;  %v2583_v46 = vadd.f32 %v3143_v17, %v2582_v21  ;;  %v2631_v42 = vor.u32 1.1754944e-38, %v2630_v56  ;;  %vm2629_vm11 = vcmp.eq.f32.partialorder %v2628_v54, 8.507059e+37 }
 0xa83   : > { %2665 = vst.msk [vmem:[%s4522_s0] sm:$0xff] %vm2664_vm6, %v2617_v30 }
 0xa84   : > { %v2899_v29 = vmul.f32 -1.442695, %v2583_v46 }
 0xa86   : > { %v3233_v50 = vpop.eup %3232  ;;  %3234 = vpow2.f32 %v2899_v29 }
 0xa87   : > { %v2620_v35 = vmul.f32 %v3233_v50, %v2601_v62  ;;  %vm2625_vm8 = vweird.f32 %v3233_v50 }
 0xa88   : > { %vm2626_vm10 = vmor %vm2624_vm9, %vm2625_vm8 }
 0xa89   : > { %v2621_v4 = vsub.f32 1.0, %v2620_v35  ;;  %v2585_v3 = vpop.f32.mrf.mxu2 }
 0xa8a   : > { %v2586_v57 = vadd.f32 %v3143_v17, %v2585_v3 }
 0xa8b   : > { %v2622_v55 = vmul.f32 %v3233_v50, %v2621_v4 }
 0xa8c   : > { %v3235_v37 = vpop.eup %3234  ;;  %v2900_v60 = vmul.f32 -1.442695, %v2586_v57 }
 0xa8d   : > { %v2623_v36 = vadd.f32 %v3233_v50, %v2622_v55  ;;  %v2602_v12 = vadd.f32 1.0, %v3235_v37 }
 0xa8e   : > { %3236 = vpow2.f32 %v2900_v60 }
 0xa8f   : > { %v2627_v48 = vsel %vm2626_vm10, %v3233_v50, %v2623_v36  ;;  %3238 = vrcp.f32 %v2602_v12  ;;  %v2645_v1 = vand.u32 2147483648, %v2602_v12  ;;  %v2643_v19 = vand.u32 2147483647, %v2602_v12 }
 0xa90   : > { %v2632_v51 = vsel %vm2629_vm11, %v2631_v42, %v2627_v48  ;;  %vm2639_vm13 = vweird.f32 %v2602_v12 }
 0xa91   : > { %2666 = vst.msk [vmem:[%s4522_s0 + $0x8] sm:$0xff] %vm2664_vm6, %v2632_v51  ;;  %v2646_v20 = vor.u32 1.1754944e-38, %v2645_v1  ;;  %vm2644_vm15 = vcmp.eq.f32.partialorder %v2643_v19, 8.507059e+37 }
 0xa94   : > { %v3237_v0 = vpop.eup %3236 }
 0xa95   : > { %v3239_v5 = vpop.eup %3238  ;;  %v2603_v6 = vadd.f32 1.0, %v3237_v0 }
 0xa96   : > { %v2635_v10 = vmul.f32 %v3239_v5, %v2602_v12  ;;  %vm2640_vm12 = vweird.f32 %v3239_v5 }
 0xa97   : > { %3240 = vrcp.f32 %v2603_v6  ;;  %vm2641_vm14 = vmor %vm2639_vm13, %vm2640_vm12  ;;  %v2660_v40 = vand.u32 2147483648, %v2603_v6  ;;  %v2658_v9 = vand.u32 2147483647, %v2603_v6  ;;  %vm2654_vm2 = vweird.f32 %v2603_v6 }
 0xa98   : > { %v2636_v13 = vsub.f32 1.0, %v2635_v10 }
 0xa99   : > { %v2661_v26 = vor.u32 1.1754944e-38, %v2660_v40  ;;  %vm2659_vm0 = vcmp.eq.f32.partialorder %v2658_v9, 8.507059e+37 }
 0xa9a   : > { %v2637_v18 = vmul.f32 %v3239_v5, %v2636_v13 }
 0xa9c   : > { %v2638_v63 = vadd.f32 %v3239_v5, %v2637_v18 }
 0xa9d   : > { %v3241_v8 = vpop.eup %3240 }
 0xa9e   : > { %v2642_v11 = vsel %vm2641_vm14, %v3239_v5, %v2638_v63  ;;  %v2650_v14 = vmul.f32 %v3241_v8, %v2603_v6  ;;  %vm2655_vm1 = vweird.f32 %v3241_v8 }
 0xa9f   : > { %v2647_v44 = vsel %vm2644_vm15, %v2646_v20, %v2642_v11  ;;  %vm2656_vm3 = vmor %vm2654_vm2, %vm2655_vm1 }
 0xaa0   : > { %2667 = vst.msk [vmem:[%s4522_s0 + $0x10] sm:$0xff] %vm2664_vm6, %v2647_v44  ;;  %v2651_v39 = vsub.f32 1.0, %v2650_v14 }
 0xaa2   : > { %v2652_v22 = vmul.f32 %v3241_v8, %v2651_v39 }
 0xaa4   : > { %v2653_v24 = vadd.f32 %v3241_v8, %v2652_v22 }
 0xaa6   : > { %v2657_v27 = vsel %vm2656_vm3, %v3241_v8, %v2653_v24 }
 0xaa7   : > { %v2662_v31 = vsel %vm2659_vm0, %v2661_v26, %v2657_v27 }
 0xaa8   : > { %2668 = vst.msk [vmem:[%s4522_s0 + $0x18] sm:$0xff] %vm2664_vm6, %v2662_v31 }
 0xaa9 PF: > { %s4628_s4 = sld [smem:[#allocation8_spill]] }
 0xaaa   : > { %s4629_s7 = sld [smem:[#allocation6_spill]] }
 0xaaf   : > { %p2945_p4 = scmp.ge.s32.totalorder %s4628_s4, 2 }
 0xab0   : > { %s2719_s26 = sand.u32 1, %s4629_s7  }
 0xab1   : > { %p2942_p5 = pnand %p2945_p4, %p3495_p6  ;;  %s2720_s29 = scalar_lea.sflag [#allocation4], %s2719_s26 }
 0xab3   : > { %p2943_p7 = pneg %p2942_p5 }
 0xab5   : > { %3291 = dma.done.wait (%p2943_p7), %s2720_s29, 512  }
 0xab6   : > { %3293 = vsyncadd (%p2943_p7), %s2720_s29, 4294966784  ;;  %s4631_s3 = sld [smem:[#allocation9_spill]]  ;;  %s4634_s6 = smov %s3300_s30 }
 0xab7   : > { %s4632_s24 = sld [smem:[#allocation7_spill]] }
 0xab8   : > { %s4633_s7 = sld [smem:[#allocation10_spill]] }
 0xabc   : > { %p38_p8 = scmp.ge.s32.totalorder %s4631_s3, 4  }
 0xabd   : > { %s4635_s30 = smov %s4632_s24 }
 0xabe   :  { %40 = sbr.rel (!%p38_p8) target bundleno = 18 (0x12), region = 169 }
 0xac3   :  { %2726 = vsyncpa [#allocation4], 1 }
 0xac4   :  { %2728 = vsyncpa [#allocation4 + $0x1], 1 }

</bundles_post_ra>
